<compile_context>
chip_gen: v7x
topology: tpu7x:2x2x1
jax: 0.10.0
libtpu: 0.0.40
codegen_flags: <defaults>
</compile_context>

<pallas_src>
import functools

import numpy as np
import jax
import jax.numpy as jnp
from jax.experimental import pallas as pl
from jax.experimental.pallas import tpu as pltpu

_EPS = 1e-5  # PyTorch default eps for InstanceNorm2d / BatchNorm2d


# ------------------------------ per-sample fused block -------------------------------


def _conv_dw_in_sample(x, w, b, wd, bd, m_cl, m_cr, m_rt, m_rb, *, W):
    """Conv1x1 -> depthwise 3x3 (pad=1) -> InstanceNorm for one sample / channel tile.

    x:   (Cin, P) f32, P = H*W flattened on lanes.
    w:   (Ct, Cin) f32 pointwise weights.        b:  (Ct, 1) pointwise bias.
    wd:  (9, Ct, 1) depthwise taps (row-major).  bd: (Ct, 1) depthwise bias.
    m_cl/m_cr: (1, P) column masks (col != W-1 / col != 0) applied to the SOURCE.
    m_rt/m_rb: (1, P) row masks (row != 0 / row != H-1) applied to the rolled result.
    Returns (zin (Ct,P) f32, ss (Ct,1) f32) with ss = mean(zin^2) over H*W.
    """
    cin, P = x.shape

    # ---- 1x1 conv: MXU matmul (f32 accum) with the FMA loop only for tiny Cin ----
    if cin >= 16:
        y = jnp.dot(w, x, preferred_element_type=jnp.float32) + b
    else:
        y = w[:, 0:1] * x[0:1, :] + b
        for ci in range(1, cin):
            y = y + w[:, ci:ci + 1] * x[ci:ci + 1, :]

    # ---- depthwise 3x3, padding=1: source-premasked column rolls + row rolls ----
    # Neighbour at dj=-1: zero wrapped col W-1 in the source, then roll by +1.
    c_m = pltpu.roll(y * m_cl, 1, axis=1)
    # Neighbour at dj=+1: zero wrapped col 0 in the source, then roll by -1 (== P-1).
    c_p = pltpu.roll(y * m_cr, P - 1, axis=1)
    cols = (c_m, y, c_p)

    rows = []
    for r3 in range(3):                       # r3 = 0,1,2  <->  di = -1,0,+1
        rr = wd[3 * r3 + 0] * cols[0]
        rr = rr + wd[3 * r3 + 1] * cols[1]
        rr = rr + wd[3 * r3 + 2] * cols[2]
        rows.append(rr)

    z = rows[1] + bd                                          # di = 0 (bias folded in)
    z = z + m_rt * pltpu.roll(rows[0], W, axis=1)             # di = -1, mask row 0
    z = z + m_rb * pltpu.roll(rows[2], P - W, axis=1)         # di = +1, mask row H-1

    # ---- InstanceNorm2d: per-(n,c) stats over H*W, biased var, no affine ----
    inv_p = 1.0 / P
    m = jnp.sum(z, axis=1, keepdims=True) * inv_p
    zc = z - m                                # cached; reused for variance
    v = jnp.sum(zc * zc, axis=1, keepdims=True) * inv_p
    zin = zc * jax.lax.rsqrt(v + _EPS)
    ss = v / (v + _EPS)                       # = mean(zin^2); sum(zin) = 0 exactly
    return zin, ss


# ------------------------------ kernels ----------------------------------------------


def _block1_kernel(x_ref, w_ref, b_ref, wd_ref, bd_ref, mask_ref, z_ref, ss_ref, *, W):
    w = w_ref[...].astype(jnp.float32)
    b = b_ref[...]
    wd = wd_ref[...]
    bd = bd_ref[...]
    m_cl, m_cr, m_rt, m_rb = mask_ref[0], mask_ref[1], mask_ref[2], mask_ref[3]
    bn = x_ref.shape[0]
    for s in range(bn):
        zin, ss = _conv_dw_in_sample(x_ref[s].astype(jnp.float32), w, b, wd, bd,
                                     m_cl, m_cr, m_rt, m_rb, W=W)
        z_ref[s] = zin.astype(z_ref.dtype)
        ss_ref[s] = ss


def _block2_kernel(z1_ref, sc_ref, sh_ref, w_ref, b_ref, wd_ref, bd_ref, mask_ref,
                   z_ref, ss_ref, *, W):
    w = w_ref[...].astype(jnp.float32)
    b = b_ref[...]
    wd = wd_ref[...]
    bd = bd_ref[...]
    sc = sc_ref[...]
    sh = sh_ref[...]
    m_cl, m_cr, m_rt, m_rb = mask_ref[0], mask_ref[1], mask_ref[2], mask_ref[3]
    bn = z1_ref.shape[0]
    for s in range(bn):
        # BatchNorm1 (folded scale/shift) + ReLU on the full input-channel block.
        h = jnp.maximum(z1_ref[s].astype(jnp.float32) * sc + sh, 0.0)
        zin, ss = _conv_dw_in_sample(h, w, b, wd, bd, m_cl, m_cr, m_rt, m_rb, W=W)
        z_ref[s] = zin.astype(z_ref.dtype)
        ss_ref[s] = ss


def _bn_relu_kernel(z_ref, sc_ref, sh_ref, o_ref):
    o_ref[...] = jnp.maximum(
        z_ref[...].astype(jnp.float32) * sc_ref[...] + sh_ref[...], 0.0
    ).astype(o_ref.dtype)


# ------------------------------ wrapper -----------------------------------------------


def _choose_tiles(N, Cin, Cout, P):
    """Pick (samples-per-block Bn, channels-per-tile Ct)."""
    lane_bytes = P * 4  # f32 bytes per channel row
    # Channel tiling (bounds VMEM, v7x 64 MiB): largest multiple-of-8 divisor of Cout
    # whose f32 tile stays under ~4 MiB; otherwise keep full Cout.
    ct = Cout
    if Cout * lane_bytes > (4 << 20):
        for d in range(Cout, 7, -1):
            if Cout % d == 0 and d % 8 == 0 and d * lane_bytes <= (4 << 20):
                ct = d
                break
    # Multi-sample blocking (v5e/v6e, 128 MiB VMEM): amortize the ~0.35us/step grid
    # overhead when one sample is tiny.  Cap unrolling at 8 samples per block.
    bn = 1
    if ct == Cout:
        per_sample = max(Cin, Cout) * lane_bytes
        cap = max(1, min(8, (2 << 20) // max(per_sample, 1)))
        for d in range(min(N, cap), 0, -1):
            if N % d == 0:
                bn = d
                break
    return bn, ct


def _compiler_params(in_bytes, out_bytes, work_bytes):
    est = 2 * (in_bytes + out_bytes) + work_bytes + (8 << 20)   # 2x = double buffering
    lim = int(min(max(est, 16 << 20), 100 << 20))
    return pltpu.CompilerParams(
        dimension_semantics=("parallel", "parallel"),
        vmem_limit_bytes=lim,
    )


def _bn_fold(ss, gamma, beta):
    """Fold training-mode BatchNorm batch stats into per-channel scale/shift.

    Post-InstanceNorm the batch mean is exactly 0 and E[z^2] = mean_n(v_n/(v_n+eps)),
    which is what the kernels emit as `ss` -- no full-size sweeps needed.
    """
    var = jnp.mean(ss[:, :, 0].astype(jnp.float32), axis=0)     # (C,)
    scale = gamma.astype(jnp.float32) / jnp.sqrt(var + _EPS)
    shift = beta.astype(jnp.float32)
    return scale.reshape(-1, 1), shift.reshape(-1, 1)


def _forward_impl(x_nchw, params):
    N, Cin, H, W = x_nchw.shape
    Cout = params["w1"].shape[0]
    P = H * W
    out_dtype = x_nchw.dtype

    # Free reshape: NCHW -> (N, C, H*W).  No activation transposes at the boundary.
    x = x_nchw.reshape(N, Cin, P)

    f32 = jnp.float32
    w1 = params["w1"][:, :, 0, 0].astype(f32)                   # (Cout, Cin)
    w2 = params["w2"][:, :, 0, 0].astype(f32)                   # (Cout, Cout)
    b1 = params["b1"].reshape(-1, 1).astype(f32)
    b2 = params["b2"].reshape(-1, 1).astype(f32)
    wd1 = params["wd1"].reshape(Cout, 9).T[..., None].astype(f32)   # (9, Cout, 1)
    wd2 = params["wd2"].reshape(Cout, 9).T[..., None].astype(f32)
    bd1 = params["bd1"].reshape(-1, 1).astype(f32)
    bd2 = params["bd2"].reshape(-1, 1).astype(f32)

    # Edge-validity masks for the depthwise conv (built once; tiny).
    row = jnp.arange(P, dtype=jnp.int32) // W
    col = jnp.arange(P, dtype=jnp.int32) % W
    mask4 = jnp.stack(
        [(col != W - 1), (col != 0), (row != 0), (row != H - 1)], axis=0
    ).astype(f32).reshape(4, 1, P)

    Bn, Ct = _choose_tiles(N, Cin, Cout, P)
    grid = (N // Bn, Cout // Ct)

    z_dtype = jnp.bfloat16        # storage-only: compute stays f32 inside the kernels
    z_item = 2
    x_item = x.dtype.itemsize

    # ---- BlockSpecs ----
    x_spec = pl.BlockSpec((Bn, Cin, P), lambda nb, c: (nb, 0, 0))
    z1_full_spec = pl.BlockSpec((Bn, Cout, P), lambda nb, c: (nb, 0, 0))
    zt_spec = pl.BlockSpec((Bn, Ct, P), lambda nb, c: (nb, c, 0))
    ss_spec = pl.BlockSpec((Bn, Ct, 1), lambda nb, c: (nb, c, 0))
    w1_spec = pl.BlockSpec((Ct, Cin), lambda nb, c: (c, 0))
    w2_spec = pl.BlockSpec((Ct, Cout), lambda nb, c: (c, 0))
    cvec_spec = pl.BlockSpec((Ct, 1), lambda nb, c: (c, 0))
    chan_full_spec = pl.BlockSpec((Cout, 1), lambda nb, c: (0, 0))
    wd_spec = pl.BlockSpec((9, Ct, 1), lambda nb, c: (0, c, 0))
    mask_spec = pl.BlockSpec((4, 1, P), lambda nb, c: (0, 0, 0))

    z_shape = jax.ShapeDtypeStruct((N, Cout, P), z_dtype)
    ss_shape = jax.ShapeDtypeStruct((N, Cout, 1), f32)

    work = (max(Cin, Cout) + 8 * Ct) * P * 4
    small = (2 * Ct + 9 * Ct) * 4 + 4 * P * 4

    # ---- pass 1: block1 up through InstanceNorm, plus BN1 stat ----
    in1 = Bn * Cin * P * x_item + Ct * Cin * 4 + small
    out1 = Bn * Ct * P * z_item + Bn * Ct * 4
    z1, ss1 = pl.pallas_call(
        functools.partial(_block1_kernel, W=W),
        grid=grid,
        in_specs=[x_spec, w1_spec, cvec_spec, wd_spec, cvec_spec, mask_spec],
        out_specs=(zt_spec, ss_spec),
        out_shape=(z_shape, ss_shape),
        compiler_params=_compiler_params(in1, out1, work),
    )(x, w1, b1, wd1, bd1, mask4)

    sc1, sh1 = _bn_fold(ss1, params["g1"], params["be1"])

    # ---- pass 2: BN1+ReLU, block2 up through InstanceNorm, plus BN2 stat ----
    in2 = Bn * Cout * P * z_item + 2 * Cout * 4 + Ct * Cout * 4 + small
    out2 = out1
    z2, ss2 = pl.pallas_call(
        functools.partial(_block2_kernel, W=W),
        grid=grid,
        in_specs=[z1_full_spec, chan_full_spec, chan_full_spec,
                  w2_spec, cvec_spec, wd_spec, cvec_spec, mask_spec],
        out_specs=(zt_spec, ss_spec),
        out_shape=(z_shape, ss_shape),
        compiler_params=_compiler_params(in2, out2, work),
    )(z1, sc1, sh1, w2, b2, wd2, bd2, mask4)

    sc2, sh2 = _bn_fold(ss2, params["g2"], params["be2"])

    # ---- pass 3: BN2 + ReLU ----
    in3 = Bn * Ct * P * z_item + 2 * Ct * 4
    out3 = Bn * Ct * P * np.dtype(out_dtype).itemsize
    out = pl.pallas_call(
        _bn_relu_kernel,
        grid=grid,
        in_specs=[zt_spec, cvec_spec, cvec_spec],
        out_specs=zt_spec,
        out_shape=jax.ShapeDtypeStruct((N, Cout, P), out_dtype),
        compiler_params=_compiler_params(in3, out3, Bn * Ct * P * 4),
    )(z2, sc2, sh2)

    return out.reshape(N, Cout, H, W)


_forward_jit = jax.jit(_forward_impl)


def conv_module_forward(x_nchw, params, drop=0.0):
    """NCHW in / NCHW out, matching ConvModule.forward in train mode."""
    # TODO(synk): non-zero Dropout needs PyTorch-equivalent RNG; only p=0.0 supported.
    assert drop == 0.0, "Dropout p != 0.0 is not implemented"
    return _forward_jit(x_nchw, params)


# ------------------------------ pure-JAX reference ------------------------------------


def conv_module_reference(x, params):
    """Pure-JAX (XLA) reference in NCHW for correctness check."""
    def conv1x1(h, w, b):
        y = jax.lax.conv_general_dilated(h, w, (1, 1), "VALID",
                                         dimension_numbers=("NCHW", "OIHW", "NCHW"))
        return y + b.reshape(1, -1, 1, 1)

    def dwconv3x3(h, w, b):
        y = jax.lax.conv_general_dilated(h, w, (1, 1), ((1, 1), (1, 1)),
                                         dimension_numbers=("NCHW", "OIHW", "NCHW"),
                                         feature_group_count=h.shape[1])
        return y + b.reshape(1, -1, 1, 1)

    def inorm(h):
        m = jnp.mean(h, axis=(2, 3), keepdims=True)
        v = jnp.mean((h - m) ** 2, axis=(2, 3), keepdims=True)
        return (h - m) / jnp.sqrt(v + _EPS)

    def bnorm(h, g, b):
        m = jnp.mean(h, axis=(0, 2, 3), keepdims=True)
        v = jnp.mean((h - m) ** 2, axis=(0, 2, 3), keepdims=True)
        return (h - m) / jnp.sqrt(v + _EPS) * g.reshape(1, -1, 1, 1) + b.reshape(1, -1, 1, 1)

    h = x.astype(jnp.float32)
    for p in ("1", "2"):
        h = conv1x1(h, params["w" + p], params["b" + p])
        h = dwconv3x3(h, params["wd" + p], params["bd" + p])
        h = inorm(h)
        h = bnorm(h, params["g" + p], params["be" + p])
        h = jnp.maximum(h, 0.0)
    return h


# ------------------------------ self-test ----------------------------------------------


if __name__ == "__main__":
    N, Cin, Cout, H, W = 2, 4, 8, 16, 16
    key = jax.random.PRNGKey(0)
    ks = jax.random.split(key, 9)
    x = jax.random.normal(ks[0], (N, Cin, H, W), jnp.float32)
    params = {
        "w1": 0.3 * jax.random.normal(ks[1], (Cout, Cin, 1, 1), jnp.float32),
        "b1": 0.1 * jax.random.normal(ks[2], (Cout,), jnp.float32),
        "wd1": 0.3 * jax.random.normal(ks[3], (Cout, 1, 3, 3), jnp.float32),
        "bd1": 0.1 * jax.random.normal(ks[4], (Cout,), jnp.float32),
        "g1": jnp.ones((Cout,), jnp.float32),    # BatchNorm weight init (PyTorch default)
        "be1": jnp.zeros((Cout,), jnp.float32),  # BatchNorm bias init
        "w2": 0.3 * jax.random.normal(ks[5], (Cout, Cout, 1, 1), jnp.float32),
        "b2": 0.1 * jax.random.normal(ks[6], (Cout,), jnp.float32),
        "wd2": 0.3 * jax.random.normal(ks[7], (Cout, 1, 3, 3), jnp.float32),
        "bd2": 0.1 * jax.random.normal(ks[8], (Cout,), jnp.float32),
        "g2": jnp.ones((Cout,), jnp.float32),
        "be2": jnp.zeros((Cout,), jnp.float32),
    }

    out = jax.block_until_ready(conv_module_forward(x, params))
    ref = jax.block_until_ready(conv_module_reference(x, params))
    assert out.shape == (N, Cout, H, W), out.shape
    max_err = float(jnp.max(jnp.abs(out.astype(jnp.float32) - ref)))
    # bf16 inter-pass intermediates -> ~0.2-0.5% relative error vs the pure-f32 reference.
    assert jnp.allclose(out.astype(jnp.float32), ref, rtol=3e-2, atol=3e-2), \
        f"max_err={max_err}"
    print("KERNEL_OK")
</pallas_src>

<mosaic_0001>
module attributes {stable_mosaic.version = 11 : i64} {
  func.func @_bn_relu_kernel(%arg0: i32, %arg1: i32, %arg2: memref<2x8x256xbf16, #tpu.memory_space<vmem>>, %arg3: memref<8x1xf32, #tpu.memory_space<vmem>>, %arg4: memref<8x1xf32, #tpu.memory_space<vmem>>, %arg5: memref<2x8x256xf32, #tpu.memory_space<vmem>>) attributes {dimension_semantics = [#tpu.dimension_semantics<parallel>, #tpu.dimension_semantics<parallel>], iteration_bounds = array<i64: 1, 1>, scalar_prefetch = 0 : i64, scratch_operands = 0 : i64, tpu.core_type = #tpu.core_type<tc>, window_params = [{transform_indices = @transform_0, window_bounds = array<i64: 2, 8, 256>}, {transform_indices = @transform_1, window_bounds = array<i64: 8, 1>}, {transform_indices = @transform_2, window_bounds = array<i64: 8, 1>}, {transform_indices = @transform_3, window_bounds = array<i64: 2, 8, 256>}]} {
    %c0 = arith.constant 0 : index
    %c0_0 = arith.constant 0 : index
    %c0_1 = arith.constant 0 : index
    %0 = vector.load %arg2[%c0, %c0_0, %c0_1] : memref<2x8x256xbf16, #tpu.memory_space<vmem>>, vector<2x8x256xbf16>
    %1 = arith.extf %0 : vector<2x8x256xbf16> to vector<2x8x256xf32>
    %c0_2 = arith.constant 0 : index
    %c0_3 = arith.constant 0 : index
    %2 = vector.load %arg3[%c0_2, %c0_3] : memref<8x1xf32, #tpu.memory_space<vmem>>, vector<8x1xf32>
    %3 = vector.shape_cast %2 : vector<8x1xf32> to vector<1x8x1xf32>
    %4 = vector.broadcast %3 : vector<1x8x1xf32> to vector<2x8x256xf32>
    %5 = arith.mulf %1, %4 : vector<2x8x256xf32>
    %c0_4 = arith.constant 0 : index
    %c0_5 = arith.constant 0 : index
    %6 = vector.load %arg4[%c0_4, %c0_5] : memref<8x1xf32, #tpu.memory_space<vmem>>, vector<8x1xf32>
    %7 = vector.shape_cast %6 : vector<8x1xf32> to vector<1x8x1xf32>
    %8 = vector.broadcast %7 : vector<1x8x1xf32> to vector<2x8x256xf32>
    %9 = arith.addf %5, %8 : vector<2x8x256xf32>
    %cst = arith.constant 0.000000e+00 : f32
    %10 = vector.broadcast %cst : f32 to vector<2x8x256xf32>
    %11 = arith.maximumf %9, %10 : vector<2x8x256xf32>
    %c0_6 = arith.constant 0 : index
    %c0_7 = arith.constant 0 : index
    %c0_8 = arith.constant 0 : index
    %12 = vector.load %arg5[%c0_6, %c0_7, %c0_8] : memref<2x8x256xf32, #tpu.memory_space<vmem>>, vector<2x8x256xf32>
    tpu.vector_store %arg5[%c0_6, %c0_7, %c0_8], %11 {strides = array<i32>} : memref<2x8x256xf32, #tpu.memory_space<vmem>>, vector<2x8x256xf32>,
    return
  }
  func.func @transform_0(%arg0: i32, %arg1: i32) -> (i32, i32, i32) {
    %c0_i32 = arith.constant 0 : i32
    %c0_i32_0 = arith.constant 0 : i32
    return %arg0, %arg1, %c0_i32 : i32, i32, i32
  }
  func.func @transform_1(%arg0: i32, %arg1: i32) -> (i32, i32) {
    %c0_i32 = arith.constant 0 : i32
    %c0_i32_0 = arith.constant 0 : i32
    return %arg1, %c0_i32 : i32, i32
  }
  func.func @transform_2(%arg0: i32, %arg1: i32) -> (i32, i32) {
    %c0_i32 = arith.constant 0 : i32
    %c0_i32_0 = arith.constant 0 : i32
    return %arg1, %c0_i32 : i32, i32
  }
  func.func @transform_3(%arg0: i32, %arg1: i32) -> (i32, i32, i32) {
    %c0_i32 = arith.constant 0 : i32
    %c0_i32_0 = arith.constant 0 : i32
    return %arg0, %arg1, %c0_i32 : i32, i32, i32
  }
}

module attributes {stable_mosaic.version = 11 : i64} {
  func.func @_block2_kernel(%arg0: i32, %arg1: i32, %arg2: memref<2x8x256xbf16, #tpu.memory_space<vmem>>, %arg3: memref<8x1xf32, #tpu.memory_space<vmem>>, %arg4: memref<8x1xf32, #tpu.memory_space<vmem>>, %arg5: memref<8x8xf32, #tpu.memory_space<vmem>>, %arg6: memref<8x1xf32, #tpu.memory_space<vmem>>, %arg7: memref<9x8x1xf32, #tpu.memory_space<vmem>>, %arg8: memref<8x1xf32, #tpu.memory_space<vmem>>, %arg9: memref<4x1x256xf32, #tpu.memory_space<vmem>>, %arg10: memref<2x8x256xbf16, #tpu.memory_space<vmem>>, %arg11: memref<2x8x1xf32, #tpu.memory_space<vmem>>) attributes {dimension_semantics = [#tpu.dimension_semantics<parallel>, #tpu.dimension_semantics<parallel>], iteration_bounds = array<i64: 1, 1>, scalar_prefetch = 0 : i64, scratch_operands = 0 : i64, tpu.core_type = #tpu.core_type<tc>, window_params = [{transform_indices = @transform_0, window_bounds = array<i64: 2, 8, 256>}, {pipeline_mode = #tpu.pipeline_mode<synchronous>, transform_indices = @transform_1, window_bounds = array<i64: 8, 1>}, {pipeline_mode = #tpu.pipeline_mode<synchronous>, transform_indices = @transform_2, window_bounds = array<i64: 8, 1>}, {transform_indices = @transform_3, window_bounds = array<i64: 8, 8>}, {transform_indices = @transform_4, window_bounds = array<i64: 8, 1>}, {transform_indices = @transform_5, window_bounds = array<i64: 9, 8, 1>}, {transform_indices = @transform_6, window_bounds = array<i64: 8, 1>}, {pipeline_mode = #tpu.pipeline_mode<synchronous>, transform_indices = @transform_7, window_bounds = array<i64: 4, 1, 256>}, {transform_indices = @transform_8, window_bounds = array<i64: 2, 8, 256>}, {transform_indices = @transform_9, window_bounds = array<i64: 2, 8, 1>}]} {
    %c0 = arith.constant 0 : index
    %c0_0 = arith.constant 0 : index
    %0 = vector.load %arg5[%c0, %c0_0] : memref<8x8xf32, #tpu.memory_space<vmem>>, vector<8x8xf32>
    %c0_1 = arith.constant 0 : index
    %c0_2 = arith.constant 0 : index
    %1 = vector.load %arg6[%c0_1, %c0_2] : memref<8x1xf32, #tpu.memory_space<vmem>>, vector<8x1xf32>
    %c0_3 = arith.constant 0 : index
    %c0_4 = arith.constant 0 : index
    %c0_5 = arith.constant 0 : index
    %2 = vector.load %arg7[%c0_3, %c0_4, %c0_5] : memref<9x8x1xf32, #tpu.memory_space<vmem>>, vector<9x8x1xf32>
    %c0_6 = arith.constant 0 : index
    %c0_7 = arith.constant 0 : index
    %3 = vector.load %arg8[%c0_6, %c0_7] : memref<8x1xf32, #tpu.memory_space<vmem>>, vector<8x1xf32>
    %c0_8 = arith.constant 0 : index
    %c0_9 = arith.constant 0 : index
    %4 = vector.load %arg3[%c0_8, %c0_9] : memref<8x1xf32, #tpu.memory_space<vmem>>, vector<8x1xf32>
    %c0_10 = arith.constant 0 : index
    %c0_11 = arith.constant 0 : index
    %5 = vector.load %arg4[%c0_10, %c0_11] : memref<8x1xf32, #tpu.memory_space<vmem>>, vector<8x1xf32>
    %c0_12 = arith.constant 0 : index
    %c0_13 = arith.constant 0 : index
    %c0_14 = arith.constant 0 : index
    %6 = vector.load %arg9[%c0_12, %c0_13, %c0_14] : memref<4x1x256xf32, #tpu.memory_space<vmem>>, vector<1x1x256xf32>
    %7 = vector.shape_cast %6 : vector<1x1x256xf32> to vector<1x256xf32>
    %c1 = arith.constant 1 : index
    %c0_15 = arith.constant 0 : index
    %c0_16 = arith.constant 0 : index
    %8 = vector.load %arg9[%c1, %c0_15, %c0_16] : memref<4x1x256xf32, #tpu.memory_space<vmem>>, vector<1x1x256xf32>
    %9 = vector.shape_cast %8 : vector<1x1x256xf32> to vector<1x256xf32>
    %c2 = arith.constant 2 : index
    %c0_17 = arith.constant 0 : index
    %c0_18 = arith.constant 0 : index
    %10 = vector.load %arg9[%c2, %c0_17, %c0_18] : memref<4x1x256xf32, #tpu.memory_space<vmem>>, vector<1x1x256xf32>
    %11 = vector.shape_cast %10 : vector<1x1x256xf32> to vector<1x256xf32>
    %c3 = arith.constant 3 : index
    %c0_19 = arith.constant 0 : index
    %c0_20 = arith.constant 0 : index
    %12 = vector.load %arg9[%c3, %c0_19, %c0_20] : memref<4x1x256xf32, #tpu.memory_space<vmem>>, vector<1x1x256xf32>
    %13 = vector.shape_cast %12 : vector<1x1x256xf32> to vector<1x256xf32>
    %c0_21 = arith.constant 0 : index
    %c0_22 = arith.constant 0 : index
    %c0_23 = arith.constant 0 : index
    %14 = vector.load %arg2[%c0_21, %c0_22, %c0_23] : memref<2x8x256xbf16, #tpu.memory_space<vmem>>, vector<1x8x256xbf16>
    %15 = vector.shape_cast %14 : vector<1x8x256xbf16> to vector<8x256xbf16>
    %16 = arith.extf %15 : vector<8x256xbf16> to vector<8x256xf32>
    %17 = vector.broadcast %4 : vector<8x1xf32> to vector<8x256xf32>
    %18 = arith.mulf %16, %17 : vector<8x256xf32>
    %19 = vector.broadcast %5 : vector<8x1xf32> to vector<8x256xf32>
    %20 = arith.addf %18, %19 : vector<8x256xf32>
    %cst = arith.constant 0.000000e+00 : f32
    %21 = vector.broadcast %cst : f32 to vector<8x256xf32>
    %22 = arith.maximumf %20, %21 : vector<8x256xf32>
    %23 = vector.extract_strided_slice %0 {offsets = [0, 0], sizes = [8, 1], strides = [1, 1]} : vector<8x8xf32> to vector<8x1xf32>
    %24 = vector.extract_strided_slice %22 {offsets = [0, 0], sizes = [1, 256], strides = [1, 1]} : vector<8x256xf32> to vector<1x256xf32>
    %25 = vector.broadcast %23 : vector<8x1xf32> to vector<8x256xf32>
    %26 = vector.broadcast %24 : vector<1x256xf32> to vector<8x256xf32>
    %27 = arith.mulf %25, %26 : vector<8x256xf32>
    %28 = vector.broadcast %1 : vector<8x1xf32> to vector<8x256xf32>
    %29 = arith.addf %27, %28 : vector<8x256xf32>
    %30 = vector.extract_strided_slice %0 {offsets = [0, 1], sizes = [8, 1], strides = [1, 1]} : vector<8x8xf32> to vector<8x1xf32>
    %31 = vector.extract_strided_slice %22 {offsets = [1, 0], sizes = [1, 256], strides = [1, 1]} : vector<8x256xf32> to vector<1x256xf32>
    %32 = vector.broadcast %30 : vector<8x1xf32> to vector<8x256xf32>
    %33 = vector.broadcast %31 : vector<1x256xf32> to vector<8x256xf32>
    %34 = arith.mulf %32, %33 : vector<8x256xf32>
    %35 = arith.addf %29, %34 : vector<8x256xf32>
    %36 = vector.extract_strided_slice %0 {offsets = [0, 2], sizes = [8, 1], strides = [1, 1]} : vector<8x8xf32> to vector<8x1xf32>
    %37 = vector.extract_strided_slice %22 {offsets = [2, 0], sizes = [1, 256], strides = [1, 1]} : vector<8x256xf32> to vector<1x256xf32>
    %38 = vector.broadcast %36 : vector<8x1xf32> to vector<8x256xf32>
    %39 = vector.broadcast %37 : vector<1x256xf32> to vector<8x256xf32>
    %40 = arith.mulf %38, %39 : vector<8x256xf32>
    %41 = arith.addf %35, %40 : vector<8x256xf32>
    %42 = vector.extract_strided_slice %0 {offsets = [0, 3], sizes = [8, 1], strides = [1, 1]} : vector<8x8xf32> to vector<8x1xf32>
    %43 = vector.extract_strided_slice %22 {offsets = [3, 0], sizes = [1, 256], strides = [1, 1]} : vector<8x256xf32> to vector<1x256xf32>
    %44 = vector.broadcast %42 : vector<8x1xf32> to vector<8x256xf32>
    %45 = vector.broadcast %43 : vector<1x256xf32> to vector<8x256xf32>
    %46 = arith.mulf %44, %45 : vector<8x256xf32>
    %47 = arith.addf %41, %46 : vector<8x256xf32>
    %48 = vector.extract_strided_slice %0 {offsets = [0, 4], sizes = [8, 1], strides = [1, 1]} : vector<8x8xf32> to vector<8x1xf32>
    %49 = vector.extract_strided_slice %22 {offsets = [4, 0], sizes = [1, 256], strides = [1, 1]} : vector<8x256xf32> to vector<1x256xf32>
    %50 = vector.broadcast %48 : vector<8x1xf32> to vector<8x256xf32>
    %51 = vector.broadcast %49 : vector<1x256xf32> to vector<8x256xf32>
    %52 = arith.mulf %50, %51 : vector<8x256xf32>
    %53 = arith.addf %47, %52 : vector<8x256xf32>
    %54 = vector.extract_strided_slice %0 {offsets = [0, 5], sizes = [8, 1], strides = [1, 1]} : vector<8x8xf32> to vector<8x1xf32>
    %55 = vector.extract_strided_slice %22 {offsets = [5, 0], sizes = [1, 256], strides = [1, 1]} : vector<8x256xf32> to vector<1x256xf32>
    %56 = vector.broadcast %54 : vector<8x1xf32> to vector<8x256xf32>
    %57 = vector.broadcast %55 : vector<1x256xf32> to vector<8x256xf32>
    %58 = arith.mulf %56, %57 : vector<8x256xf32>
    %59 = arith.addf %53, %58 : vector<8x256xf32>
    %60 = vector.extract_strided_slice %0 {offsets = [0, 6], sizes = [8, 1], strides = [1, 1]} : vector<8x8xf32> to vector<8x1xf32>
    %61 = vector.extract_strided_slice %22 {offsets = [6, 0], sizes = [1, 256], strides = [1, 1]} : vector<8x256xf32> to vector<1x256xf32>
    %62 = vector.broadcast %60 : vector<8x1xf32> to vector<8x256xf32>
    %63 = vector.broadcast %61 : vector<1x256xf32> to vector<8x256xf32>
    %64 = arith.mulf %62, %63 : vector<8x256xf32>
    %65 = arith.addf %59, %64 : vector<8x256xf32>
    %66 = vector.extract_strided_slice %0 {offsets = [0, 7], sizes = [8, 1], strides = [1, 1]} : vector<8x8xf32> to vector<8x1xf32>
    %67 = vector.extract_strided_slice %22 {offsets = [7, 0], sizes = [1, 256], strides = [1, 1]} : vector<8x256xf32> to vector<1x256xf32>
    %68 = vector.broadcast %66 : vector<8x1xf32> to vector<8x256xf32>
    %69 = vector.broadcast %67 : vector<1x256xf32> to vector<8x256xf32>
    %70 = arith.mulf %68, %69 : vector<8x256xf32>
    %71 = arith.addf %65, %70 : vector<8x256xf32>
    %72 = vector.broadcast %7 : vector<1x256xf32> to vector<8x256xf32>
    %73 = arith.mulf %71, %72 : vector<8x256xf32>
    %c1_i32 = arith.constant 1 : i32
    %74 = tpu.dynamic_rotate %73 by %c1_i32 dim 1 : vector<8x256xf32>, i32 -> vector<8x256xf32>
    %75 = vector.broadcast %9 : vector<1x256xf32> to vector<8x256xf32>
    %76 = arith.mulf %71, %75 : vector<8x256xf32>
    %c255_i32 = arith.constant 255 : i32
    %77 = tpu.dynamic_rotate %76 by %c255_i32 dim 1 : vector<8x256xf32>, i32 -> vector<8x256xf32>
    %78 = vector.extract_strided_slice %2 {offsets = [0, 0, 0], sizes = [1, 8, 1], strides = [1, 1, 1]} : vector<9x8x1xf32> to vector<1x8x1xf32>
    %79 = vector.shape_cast %78 : vector<1x8x1xf32> to vector<8x1xf32>
    %80 = vector.broadcast %79 : vector<8x1xf32> to vector<8x256xf32>
    %81 = arith.mulf %80, %74 : vector<8x256xf32>
    %82 = vector.extract_strided_slice %2 {offsets = [1, 0, 0], sizes = [1, 8, 1], strides = [1, 1, 1]} : vector<9x8x1xf32> to vector<1x8x1xf32>
    %83 = vector.shape_cast %82 : vector<1x8x1xf32> to vector<8x1xf32>
    %84 = vector.broadcast %83 : vector<8x1xf32> to vector<8x256xf32>
    %85 = arith.mulf %84, %71 : vector<8x256xf32>
    %86 = arith.addf %81, %85 : vector<8x256xf32>
    %87 = vector.extract_strided_slice %2 {offsets = [2, 0, 0], sizes = [1, 8, 1], strides = [1, 1, 1]} : vector<9x8x1xf32> to vector<1x8x1xf32>
    %88 = vector.shape_cast %87 : vector<1x8x1xf32> to vector<8x1xf32>
    %89 = vector.broadcast %88 : vector<8x1xf32> to vector<8x256xf32>
    %90 = arith.mulf %89, %77 : vector<8x256xf32>
    %91 = arith.addf %86, %90 : vector<8x256xf32>
    %92 = vector.extract_strided_slice %2 {offsets = [3, 0, 0], sizes = [1, 8, 1], strides = [1, 1, 1]} : vector<9x8x1xf32> to vector<1x8x1xf32>
    %93 = vector.shape_cast %92 : vector<1x8x1xf32> to vector<8x1xf32>
    %94 = vector.broadcast %93 : vector<8x1xf32> to vector<8x256xf32>
    %95 = arith.mulf %94, %74 : vector<8x256xf32>
    %96 = vector.extract_strided_slice %2 {offsets = [4, 0, 0], sizes = [1, 8, 1], strides = [1, 1, 1]} : vector<9x8x1xf32> to vector<1x8x1xf32>
    %97 = vector.shape_cast %96 : vector<1x8x1xf32> to vector<8x1xf32>
    %98 = vector.broadcast %97 : vector<8x1xf32> to vector<8x256xf32>
    %99 = arith.mulf %98, %71 : vector<8x256xf32>
    %100 = arith.addf %95, %99 : vector<8x256xf32>
    %101 = vector.extract_strided_slice %2 {offsets = [5, 0, 0], sizes = [1, 8, 1], strides = [1, 1, 1]} : vector<9x8x1xf32> to vector<1x8x1xf32>
    %102 = vector.shape_cast %101 : vector<1x8x1xf32> to vector<8x1xf32>
    %103 = vector.broadcast %102 : vector<8x1xf32> to vector<8x256xf32>
    %104 = arith.mulf %103, %77 : vector<8x256xf32>
    %105 = arith.addf %100, %104 : vector<8x256xf32>
    %106 = vector.extract_strided_slice %2 {offsets = [6, 0, 0], sizes = [1, 8, 1], strides = [1, 1, 1]} : vector<9x8x1xf32> to vector<1x8x1xf32>
    %107 = vector.shape_cast %106 : vector<1x8x1xf32> to vector<8x1xf32>
    %108 = vector.broadcast %107 : vector<8x1xf32> to vector<8x256xf32>
    %109 = arith.mulf %108, %74 : vector<8x256xf32>
    %110 = vector.extract_strided_slice %2 {offsets = [7, 0, 0], sizes = [1, 8, 1], strides = [1, 1, 1]} : vector<9x8x1xf32> to vector<1x8x1xf32>
    %111 = vector.shape_cast %110 : vector<1x8x1xf32> to vector<8x1xf32>
    %112 = vector.broadcast %111 : vector<8x1xf32> to vector<8x256xf32>
    %113 = arith.mulf %112, %71 : vector<8x256xf32>
    %114 = arith.addf %109, %113 : vector<8x256xf32>
    %115 = vector.extract_strided_slice %2 {offsets = [8, 0, 0], sizes = [1, 8, 1], strides = [1, 1, 1]} : vector<9x8x1xf32> to vector<1x8x1xf32>
    %116 = vector.shape_cast %115 : vector<1x8x1xf32> to vector<8x1xf32>
    %117 = vector.broadcast %116 : vector<8x1xf32> to vector<8x256xf32>
    %118 = arith.mulf %117, %77 : vector<8x256xf32>
    %119 = arith.addf %114, %118 : vector<8x256xf32>
    %120 = vector.broadcast %3 : vector<8x1xf32> to vector<8x256xf32>
    %121 = arith.addf %105, %120 : vector<8x256xf32>
    %c16_i32 = arith.constant 16 : i32
    %122 = tpu.dynamic_rotate %91 by %c16_i32 dim 1 : vector<8x256xf32>, i32 -> vector<8x256xf32>
    %123 = vector.broadcast %11 : vector<1x256xf32> to vector<8x256xf32>
    %124 = arith.mulf %123, %122 : vector<8x256xf32>
    %125 = arith.addf %121, %124 : vector<8x256xf32>
    %c240_i32 = arith.constant 240 : i32
    %126 = tpu.dynamic_rotate %119 by %c240_i32 dim 1 : vector<8x256xf32>, i32 -> vector<8x256xf32>
    %127 = vector.broadcast %13 : vector<1x256xf32> to vector<8x256xf32>
    %128 = arith.mulf %127, %126 : vector<8x256xf32>
    %129 = arith.addf %125, %128 : vector<8x256xf32>
    %cst_24 = arith.constant dense<0.000000e+00> : vector<8xf32>
    %130 = vector.multi_reduction <add>, %129, %cst_24 [1] : vector<8x256xf32> to vector<8xf32>
    %131 = vector.shape_cast %130 : vector<8xf32> to vector<8x1xf32>
    %cst_25 = arith.constant 3.906250e-03 : f32
    %132 = vector.broadcast %cst_25 : f32 to vector<8x1xf32>
    %133 = arith.mulf %131, %132 : vector<8x1xf32>
    %134 = vector.broadcast %133 : vector<8x1xf32> to vector<8x256xf32>
    %135 = arith.subf %129, %134 : vector<8x256xf32>
    %136 = arith.mulf %135, %135 : vector<8x256xf32>
    %cst_26 = arith.constant dense<0.000000e+00> : vector<8xf32>
    %137 = vector.multi_reduction <add>, %136, %cst_26 [1] : vector<8x256xf32> to vector<8xf32>
    %138 = vector.shape_cast %137 : vector<8xf32> to vector<8x1xf32>
    %cst_27 = arith.constant 3.906250e-03 : f32
    %139 = vector.broadcast %cst_27 : f32 to vector<8x1xf32>
    %140 = arith.mulf %138, %139 : vector<8x1xf32>
    %cst_28 = arith.constant 9.99999974E-6 : f32
    %141 = vector.broadcast %cst_28 : f32 to vector<8x1xf32>
    %142 = arith.addf %140, %141 : vector<8x1xf32>
    %143 = math.rsqrt %142 : vector<8x1xf32>
    %144 = vector.broadcast %143 : vector<8x1xf32> to vector<8x256xf32>
    %145 = arith.mulf %135, %144 : vector<8x256xf32>
    %cst_29 = arith.constant 9.99999974E-6 : f32
    %146 = vector.broadcast %cst_29 : f32 to vector<8x1xf32>
    %147 = arith.addf %140, %146 : vector<8x1xf32>
    %148 = arith.divf %140, %147 : vector<8x1xf32>
    %149 = arith.truncf %145 : vector<8x256xf32> to vector<8x256xbf16>
    %c0_30 = arith.constant 0 : index
    %c0_31 = arith.constant 0 : index
    %c0_32 = arith.constant 0 : index
    %150 = vector.load %arg10[%c0_30, %c0_31, %c0_32] : memref<2x8x256xbf16, #tpu.memory_space<vmem>>, vector<1x8x256xbf16>
    %151 = vector.shape_cast %150 : vector<1x8x256xbf16> to vector<8x256xbf16>
    %152 = vector.shape_cast %149 : vector<8x256xbf16> to vector<1x8x256xbf16>
    tpu.vector_store %arg10[%c0_30, %c0_31, %c0_32], %152 {strides = array<i32>} : memref<2x8x256xbf16, #tpu.memory_space<vmem>>, vector<1x8x256xbf16>,
    %c0_33 = arith.constant 0 : index
    %c0_34 = arith.constant 0 : index
    %c0_35 = arith.constant 0 : index
    %153 = vector.load %arg11[%c0_33, %c0_34, %c0_35] : memref<2x8x1xf32, #tpu.memory_space<vmem>>, vector<1x8x1xf32>
    %154 = vector.shape_cast %153 : vector<1x8x1xf32> to vector<8x1xf32>
    %155 = vector.shape_cast %148 : vector<8x1xf32> to vector<1x8x1xf32>
    tpu.vector_store %arg11[%c0_33, %c0_34, %c0_35], %155 {strides = array<i32>} : memref<2x8x1xf32, #tpu.memory_space<vmem>>, vector<1x8x1xf32>,
    %c1_36 = arith.constant 1 : index
    %c0_37 = arith.constant 0 : index
    %c0_38 = arith.constant 0 : index
    %156 = vector.load %arg2[%c1_36, %c0_37, %c0_38] : memref<2x8x256xbf16, #tpu.memory_space<vmem>>, vector<1x8x256xbf16>
    %157 = vector.shape_cast %156 : vector<1x8x256xbf16> to vector<8x256xbf16>
    %158 = arith.extf %157 : vector<8x256xbf16> to vector<8x256xf32>
    %159 = vector.broadcast %4 : vector<8x1xf32> to vector<8x256xf32>
    %160 = arith.mulf %158, %159 : vector<8x256xf32>
    %161 = vector.broadcast %5 : vector<8x1xf32> to vector<8x256xf32>
    %162 = arith.addf %160, %161 : vector<8x256xf32>
    %cst_39 = arith.constant 0.000000e+00 : f32
    %163 = vector.broadcast %cst_39 : f32 to vector<8x256xf32>
    %164 = arith.maximumf %162, %163 : vector<8x256xf32>
    %165 = vector.extract_strided_slice %0 {offsets = [0, 0], sizes = [8, 1], strides = [1, 1]} : vector<8x8xf32> to vector<8x1xf32>
    %166 = vector.extract_strided_slice %164 {offsets = [0, 0], sizes = [1, 256], strides = [1, 1]} : vector<8x256xf32> to vector<1x256xf32>
    %167 = vector.broadcast %165 : vector<8x1xf32> to vector<8x256xf32>
    %168 = vector.broadcast %166 : vector<1x256xf32> to vector<8x256xf32>
    %169 = arith.mulf %167, %168 : vector<8x256xf32>
    %170 = vector.broadcast %1 : vector<8x1xf32> to vector<8x256xf32>
    %171 = arith.addf %169, %170 : vector<8x256xf32>
    %172 = vector.extract_strided_slice %0 {offsets = [0, 1], sizes = [8, 1], strides = [1, 1]} : vector<8x8xf32> to vector<8x1xf32>
    %173 = vector.extract_strided_slice %164 {offsets = [1, 0], sizes = [1, 256], strides = [1, 1]} : vector<8x256xf32> to vector<1x256xf32>
    %174 = vector.broadcast %172 : vector<8x1xf32> to vector<8x256xf32>
    %175 = vector.broadcast %173 : vector<1x256xf32> to vector<8x256xf32>
    %176 = arith.mulf %174, %175 : vector<8x256xf32>
    %177 = arith.addf %171, %176 : vector<8x256xf32>
    %178 = vector.extract_strided_slice %0 {offsets = [0, 2], sizes = [8, 1], strides = [1, 1]} : vector<8x8xf32> to vector<8x1xf32>
    %179 = vector.extract_strided_slice %164 {offsets = [2, 0], sizes = [1, 256], strides = [1, 1]} : vector<8x256xf32> to vector<1x256xf32>
    %180 = vector.broadcast %178 : vector<8x1xf32> to vector<8x256xf32>
    %181 = vector.broadcast %179 : vector<1x256xf32> to vector<8x256xf32>
    %182 = arith.mulf %180, %181 : vector<8x256xf32>
    %183 = arith.addf %177, %182 : vector<8x256xf32>
    %184 = vector.extract_strided_slice %0 {offsets = [0, 3], sizes = [8, 1], strides = [1, 1]} : vector<8x8xf32> to vector<8x1xf32>
    %185 = vector.extract_strided_slice %164 {offsets = [3, 0], sizes = [1, 256], strides = [1, 1]} : vector<8x256xf32> to vector<1x256xf32>
    %186 = vector.broadcast %184 : vector<8x1xf32> to vector<8x256xf32>
    %187 = vector.broadcast %185 : vector<1x256xf32> to vector<8x256xf32>
    %188 = arith.mulf %186, %187 : vector<8x256xf32>
    %189 = arith.addf %183, %188 : vector<8x256xf32>
    %190 = vector.extract_strided_slice %0 {offsets = [0, 4], sizes = [8, 1], strides = [1, 1]} : vector<8x8xf32> to vector<8x1xf32>
    %191 = vector.extract_strided_slice %164 {offsets = [4, 0], sizes = [1, 256], strides = [1, 1]} : vector<8x256xf32> to vector<1x256xf32>
    %192 = vector.broadcast %190 : vector<8x1xf32> to vector<8x256xf32>
    %193 = vector.broadcast %191 : vector<1x256xf32> to vector<8x256xf32>
    %194 = arith.mulf %192, %193 : vector<8x256xf32>
    %195 = arith.addf %189, %194 : vector<8x256xf32>
    %196 = vector.extract_strided_slice %0 {offsets = [0, 5], sizes = [8, 1], strides = [1, 1]} : vector<8x8xf32> to vector<8x1xf32>
    %197 = vector.extract_strided_slice %164 {offsets = [5, 0], sizes = [1, 256], strides = [1, 1]} : vector<8x256xf32> to vector<1x256xf32>
    %198 = vector.broadcast %196 : vector<8x1xf32> to vector<8x256xf32>
    %199 = vector.broadcast %197 : vector<1x256xf32> to vector<8x256xf32>
    %200 = arith.mulf %198, %199 : vector<8x256xf32>
    %201 = arith.addf %195, %200 : vector<8x256xf32>
    %202 = vector.extract_strided_slice %0 {offsets = [0, 6], sizes = [8, 1], strides = [1, 1]} : vector<8x8xf32> to vector<8x1xf32>
    %203 = vector.extract_strided_slice %164 {offsets = [6, 0], sizes = [1, 256], strides = [1, 1]} : vector<8x256xf32> to vector<1x256xf32>
    %204 = vector.broadcast %202 : vector<8x1xf32> to vector<8x256xf32>
    %205 = vector.broadcast %203 : vector<1x256xf32> to vector<8x256xf32>
    %206 = arith.mulf %204, %205 : vector<8x256xf32>
    %207 = arith.addf %201, %206 : vector<8x256xf32>
    %208 = vector.extract_strided_slice %0 {offsets = [0, 7], sizes = [8, 1], strides = [1, 1]} : vector<8x8xf32> to vector<8x1xf32>
    %209 = vector.extract_strided_slice %164 {offsets = [7, 0], sizes = [1, 256], strides = [1, 1]} : vector<8x256xf32> to vector<1x256xf32>
    %210 = vector.broadcast %208 : vector<8x1xf32> to vector<8x256xf32>
    %211 = vector.broadcast %209 : vector<1x256xf32> to vector<8x256xf32>
    %212 = arith.mulf %210, %211 : vector<8x256xf32>
    %213 = arith.addf %207, %212 : vector<8x256xf32>
    %214 = vector.broadcast %7 : vector<1x256xf32> to vector<8x256xf32>
    %215 = arith.mulf %213, %214 : vector<8x256xf32>
    %c1_i32_40 = arith.constant 1 : i32
    %216 = tpu.dynamic_rotate %215 by %c1_i32_40 dim 1 : vector<8x256xf32>, i32 -> vector<8x256xf32>
    %217 = vector.broadcast %9 : vector<1x256xf32> to vector<8x256xf32>
    %218 = arith.mulf %213, %217 : vector<8x256xf32>
    %c255_i32_41 = arith.constant 255 : i32
    %219 = tpu.dynamic_rotate %218 by %c255_i32_41 dim 1 : vector<8x256xf32>, i32 -> vector<8x256xf32>
    %220 = vector.extract_strided_slice %2 {offsets = [0, 0, 0], sizes = [1, 8, 1], strides = [1, 1, 1]} : vector<9x8x1xf32> to vector<1x8x1xf32>
    %221 = vector.shape_cast %220 : vector<1x8x1xf32> to vector<8x1xf32>
    %222 = vector.broadcast %221 : vector<8x1xf32> to vector<8x256xf32>
    %223 = arith.mulf %222, %216 : vector<8x256xf32>
    %224 = vector.extract_strided_slice %2 {offsets = [1, 0, 0], sizes = [1, 8, 1], strides = [1, 1, 1]} : vector<9x8x1xf32> to vector<1x8x1xf32>
    %225 = vector.shape_cast %224 : vector<1x8x1xf32> to vector<8x1xf32>
    %226 = vector.broadcast %225 : vector<8x1xf32> to vector<8x256xf32>
    %227 = arith.mulf %226, %213 : vector<8x256xf32>
    %228 = arith.addf %223, %227 : vector<8x256xf32>
    %229 = vector.extract_strided_slice %2 {offsets = [2, 0, 0], sizes = [1, 8, 1], strides = [1, 1, 1]} : vector<9x8x1xf32> to vector<1x8x1xf32>
    %230 = vector.shape_cast %229 : vector<1x8x1xf32> to vector<8x1xf32>
    %231 = vector.broadcast %230 : vector<8x1xf32> to vector<8x256xf32>
    %232 = arith.mulf %231, %219 : vector<8x256xf32>
    %233 = arith.addf %228, %232 : vector<8x256xf32>
    %234 = vector.extract_strided_slice %2 {offsets = [3, 0, 0], sizes = [1, 8, 1], strides = [1, 1, 1]} : vector<9x8x1xf32> to vector<1x8x1xf32>
    %235 = vector.shape_cast %234 : vector<1x8x1xf32> to vector<8x1xf32>
    %236 = vector.broadcast %235 : vector<8x1xf32> to vector<8x256xf32>
    %237 = arith.mulf %236, %216 : vector<8x256xf32>
    %238 = vector.extract_strided_slice %2 {offsets = [4, 0, 0], sizes = [1, 8, 1], strides = [1, 1, 1]} : vector<9x8x1xf32> to vector<1x8x1xf32>
    %239 = vector.shape_cast %238 : vector<1x8x1xf32> to vector<8x1xf32>
    %240 = vector.broadcast %239 : vector<8x1xf32> to vector<8x256xf32>
    %241 = arith.mulf %240, %213 : vector<8x256xf32>
    %242 = arith.addf %237, %241 : vector<8x256xf32>
    %243 = vector.extract_strided_slice %2 {offsets = [5, 0, 0], sizes = [1, 8, 1], strides = [1, 1, 1]} : vector<9x8x1xf32> to vector<1x8x1xf32>
    %244 = vector.shape_cast %243 : vector<1x8x1xf32> to vector<8x1xf32>
    %245 = vector.broadcast %244 : vector<8x1xf32> to vector<8x256xf32>
    %246 = arith.mulf %245, %219 : vector<8x256xf32>
    %247 = arith.addf %242, %246 : vector<8x256xf32>
    %248 = vector.extract_strided_slice %2 {offsets = [6, 0, 0], sizes = [1, 8, 1], strides = [1, 1, 1]} : vector<9x8x1xf32> to vector<1x8x1xf32>
    %249 = vector.shape_cast %248 : vector<1x8x1xf32> to vector<8x1xf32>
    %250 = vector.broadcast %249 : vector<8x1xf32> to vector<8x256xf32>
    %251 = arith.mulf %250, %216 : vector<8x256xf32>
    %252 = vector.extract_strided_slice %2 {offsets = [7, 0, 0], sizes = [1, 8, 1], strides = [1, 1, 1]} : vector<9x8x1xf32> to vector<1x8x1xf32>
    %253 = vector.shape_cast %252 : vector<1x8x1xf32> to vector<8x1xf32>
    %254 = vector.broadcast %253 : vector<8x1xf32> to vector<8x256xf32>
    %255 = arith.mulf %254, %213 : vector<8x256xf32>
    %256 = arith.addf %251, %255 : vector<8x256xf32>
    %257 = vector.extract_strided_slice %2 {offsets = [8, 0, 0], sizes = [1, 8, 1], strides = [1, 1, 1]} : vector<9x8x1xf32> to vector<1x8x1xf32>
    %258 = vector.shape_cast %257 : vector<1x8x1xf32> to vector<8x1xf32>
    %259 = vector.broadcast %258 : vector<8x1xf32> to vector<8x256xf32>
    %260 = arith.mulf %259, %219 : vector<8x256xf32>
    %261 = arith.addf %256, %260 : vector<8x256xf32>
    %262 = vector.broadcast %3 : vector<8x1xf32> to vector<8x256xf32>
    %263 = arith.addf %247, %262 : vector<8x256xf32>
    %c16_i32_42 = arith.constant 16 : i32
    %264 = tpu.dynamic_rotate %233 by %c16_i32_42 dim 1 : vector<8x256xf32>, i32 -> vector<8x256xf32>
    %265 = vector.broadcast %11 : vector<1x256xf32> to vector<8x256xf32>
    %266 = arith.mulf %265, %264 : vector<8x256xf32>
    %267 = arith.addf %263, %266 : vector<8x256xf32>
    %c240_i32_43 = arith.constant 240 : i32
    %268 = tpu.dynamic_rotate %261 by %c240_i32_43 dim 1 : vector<8x256xf32>, i32 -> vector<8x256xf32>
    %269 = vector.broadcast %13 : vector<1x256xf32> to vector<8x256xf32>
    %270 = arith.mulf %269, %268 : vector<8x256xf32>
    %271 = arith.addf %267, %270 : vector<8x256xf32>
    %cst_44 = arith.constant dense<0.000000e+00> : vector<8xf32>
    %272 = vector.multi_reduction <add>, %271, %cst_44 [1] : vector<8x256xf32> to vector<8xf32>
    %273 = vector.shape_cast %272 : vector<8xf32> to vector<8x1xf32>
    %cst_45 = arith.constant 3.906250e-03 : f32
    %274 = vector.broadcast %cst_45 : f32 to vector<8x1xf32>
    %275 = arith.mulf %273, %274 : vector<8x1xf32>
    %276 = vector.broadcast %275 : vector<8x1xf32> to vector<8x256xf32>
    %277 = arith.subf %271, %276 : vector<8x256xf32>
    %278 = arith.mulf %277, %277 : vector<8x256xf32>
    %cst_46 = arith.constant dense<0.000000e+00> : vector<8xf32>
    %279 = vector.multi_reduction <add>, %278, %cst_46 [1] : vector<8x256xf32> to vector<8xf32>
    %280 = vector.shape_cast %279 : vector<8xf32> to vector<8x1xf32>
    %cst_47 = arith.constant 3.906250e-03 : f32
    %281 = vector.broadcast %cst_47 : f32 to vector<8x1xf32>
    %282 = arith.mulf %280, %281 : vector<8x1xf32>
    %cst_48 = arith.constant 9.99999974E-6 : f32
    %283 = vector.broadcast %cst_48 : f32 to vector<8x1xf32>
    %284 = arith.addf %282, %283 : vector<8x1xf32>
    %285 = math.rsqrt %284 : vector<8x1xf32>
    %286 = vector.broadcast %285 : vector<8x1xf32> to vector<8x256xf32>
    %287 = arith.mulf %277, %286 : vector<8x256xf32>
    %cst_49 = arith.constant 9.99999974E-6 : f32
    %288 = vector.broadcast %cst_49 : f32 to vector<8x1xf32>
    %289 = arith.addf %282, %288 : vector<8x1xf32>
    %290 = arith.divf %282, %289 : vector<8x1xf32>
    %291 = arith.truncf %287 : vector<8x256xf32> to vector<8x256xbf16>
    %c1_50 = arith.constant 1 : index
    %c0_51 = arith.constant 0 : index
    %c0_52 = arith.constant 0 : index
    %292 = vector.load %arg10[%c1_50, %c0_51, %c0_52] : memref<2x8x256xbf16, #tpu.memory_space<vmem>>, vector<1x8x256xbf16>
    %293 = vector.shape_cast %292 : vector<1x8x256xbf16> to vector<8x256xbf16>
    %294 = vector.shape_cast %291 : vector<8x256xbf16> to vector<1x8x256xbf16>
    tpu.vector_store %arg10[%c1_50, %c0_51, %c0_52], %294 {strides = array<i32>} : memref<2x8x256xbf16, #tpu.memory_space<vmem>>, vector<1x8x256xbf16>,
    %c1_53 = arith.constant 1 : index
    %c0_54 = arith.constant 0 : index
    %c0_55 = arith.constant 0 : index
    %295 = vector.load %arg11[%c1_53, %c0_54, %c0_55] : memref<2x8x1xf32, #tpu.memory_space<vmem>>, vector<1x8x1xf32>
    %296 = vector.shape_cast %295 : vector<1x8x1xf32> to vector<8x1xf32>
    %297 = vector.shape_cast %290 : vector<8x1xf32> to vector<1x8x1xf32>
    tpu.vector_store %arg11[%c1_53, %c0_54, %c0_55], %297 {strides = array<i32>} : memref<2x8x1xf32, #tpu.memory_space<vmem>>, vector<1x8x1xf32>,
    return
  }
  func.func @transform_0(%arg0: i32, %arg1: i32) -> (i32, i32, i32) {
    %c0_i32 = arith.constant 0 : i32
    %c0_i32_0 = arith.constant 0 : i32
    %c0_i32_1 = arith.constant 0 : i32
    return %arg0, %c0_i32, %c0_i32_0 : i32, i32, i32
  }
  func.func @transform_1(%arg0: i32, %arg1: i32) -> (i32, i32) {
    %c0_i32 = arith.constant 0 : i32
    %c0_i32_0 = arith.constant 0 : i32
    %c0_i32_1 = arith.constant 0 : i32
    return %c0_i32, %c0_i32_0 : i32, i32
  }
  func.func @transform_2(%arg0: i32, %arg1: i32) -> (i32, i32) {
    %c0_i32 = arith.constant 0 : i32
    %c0_i32_0 = arith.constant 0 : i32
    %c0_i32_1 = arith.constant 0 : i32
    return %c0_i32, %c0_i32_0 : i32, i32
  }
  func.func @transform_3(%arg0: i32, %arg1: i32) -> (i32, i32) {
    %c0_i32 = arith.constant 0 : i32
    %c0_i32_0 = arith.constant 0 : i32
    return %arg1, %c0_i32 : i32, i32
  }
  func.func @transform_4(%arg0: i32, %arg1: i32) -> (i32, i32) {
    %c0_i32 = arith.constant 0 : i32
    %c0_i32_0 = arith.constant 0 : i32
    return %arg1, %c0_i32 : i32, i32
  }
  func.func @transform_5(%arg0: i32, %arg1: i32) -> (i32, i32, i32) {
    %c0_i32 = arith.constant 0 : i32
    %c0_i32_0 = arith.constant 0 : i32
    %c0_i32_1 = arith.constant 0 : i32
    return %c0_i32, %arg1, %c0_i32_0 : i32, i32, i32
  }
  func.func @transform_6(%arg0: i32, %arg1: i32) -> (i32, i32) {
    %c0_i32 = arith.constant 0 : i32
    %c0_i32_0 = arith.constant 0 : i32
    return %arg1, %c0_i32 : i32, i32
  }
  func.func @transform_7(%arg0: i32, %arg1: i32) -> (i32, i32, i32) {
    %c0_i32 = arith.constant 0 : i32
    %c0_i32_0 = arith.constant 0 : i32
    %c0_i32_1 = arith.constant 0 : i32
    %c0_i32_2 = arith.constant 0 : i32
    return %c0_i32, %c0_i32_0, %c0_i32_1 : i32, i32, i32
  }
  func.func @transform_8(%arg0: i32, %arg1: i32) -> (i32, i32, i32) {
    %c0_i32 = arith.constant 0 : i32
    %c0_i32_0 = arith.constant 0 : i32
    return %arg0, %arg1, %c0_i32 : i32, i32, i32
  }
  func.func @transform_9(%arg0: i32, %arg1: i32) -> (i32, i32, i32) {
    %c0_i32 = arith.constant 0 : i32
    %c0_i32_0 = arith.constant 0 : i32
    return %arg0, %arg1, %c0_i32 : i32, i32, i32
  }
}

module attributes {stable_mosaic.version = 11 : i64} {
  func.func @_block1_kernel(%arg0: i32, %arg1: i32, %arg2: memref<2x4x256xf32, #tpu.memory_space<vmem>>, %arg3: memref<8x4xf32, #tpu.memory_space<vmem>>, %arg4: memref<8x1xf32, #tpu.memory_space<vmem>>, %arg5: memref<9x8x1xf32, #tpu.memory_space<vmem>>, %arg6: memref<8x1xf32, #tpu.memory_space<vmem>>, %arg7: memref<4x1x256xf32, #tpu.memory_space<vmem>>, %arg8: memref<2x8x256xbf16, #tpu.memory_space<vmem>>, %arg9: memref<2x8x1xf32, #tpu.memory_space<vmem>>) attributes {dimension_semantics = [#tpu.dimension_semantics<parallel>, #tpu.dimension_semantics<parallel>], iteration_bounds = array<i64: 1, 1>, scalar_prefetch = 0 : i64, scratch_operands = 0 : i64, tpu.core_type = #tpu.core_type<tc>, window_params = [{transform_indices = @transform_0, window_bounds = array<i64: 2, 4, 256>}, {transform_indices = @transform_1, window_bounds = array<i64: 8, 4>}, {transform_indices = @transform_2, window_bounds = array<i64: 8, 1>}, {transform_indices = @transform_3, window_bounds = array<i64: 9, 8, 1>}, {transform_indices = @transform_4, window_bounds = array<i64: 8, 1>}, {pipeline_mode = #tpu.pipeline_mode<synchronous>, transform_indices = @transform_5, window_bounds = array<i64: 4, 1, 256>}, {transform_indices = @transform_6, window_bounds = array<i64: 2, 8, 256>}, {transform_indices = @transform_7, window_bounds = array<i64: 2, 8, 1>}]} {
    %c0 = arith.constant 0 : index
    %c0_0 = arith.constant 0 : index
    %0 = vector.load %arg3[%c0, %c0_0] : memref<8x4xf32, #tpu.memory_space<vmem>>, vector<8x4xf32>
    %c0_1 = arith.constant 0 : index
    %c0_2 = arith.constant 0 : index
    %1 = vector.load %arg4[%c0_1, %c0_2] : memref<8x1xf32, #tpu.memory_space<vmem>>, vector<8x1xf32>
    %c0_3 = arith.constant 0 : index
    %c0_4 = arith.constant 0 : index
    %c0_5 = arith.constant 0 : index
    %2 = vector.load %arg5[%c0_3, %c0_4, %c0_5] : memref<9x8x1xf32, #tpu.memory_space<vmem>>, vector<9x8x1xf32>
    %c0_6 = arith.constant 0 : index
    %c0_7 = arith.constant 0 : index
    %3 = vector.load %arg6[%c0_6, %c0_7] : memref<8x1xf32, #tpu.memory_space<vmem>>, vector<8x1xf32>
    %c0_8 = arith.constant 0 : index
    %c0_9 = arith.constant 0 : index
    %c0_10 = arith.constant 0 : index
    %4 = vector.load %arg7[%c0_8, %c0_9, %c0_10] : memref<4x1x256xf32, #tpu.memory_space<vmem>>, vector<1x1x256xf32>
    %5 = vector.shape_cast %4 : vector<1x1x256xf32> to vector<1x256xf32>
    %c1 = arith.constant 1 : index
    %c0_11 = arith.constant 0 : index
    %c0_12 = arith.constant 0 : index
    %6 = vector.load %arg7[%c1, %c0_11, %c0_12] : memref<4x1x256xf32, #tpu.memory_space<vmem>>, vector<1x1x256xf32>
    %7 = vector.shape_cast %6 : vector<1x1x256xf32> to vector<1x256xf32>
    %c2 = arith.constant 2 : index
    %c0_13 = arith.constant 0 : index
    %c0_14 = arith.constant 0 : index
    %8 = vector.load %arg7[%c2, %c0_13, %c0_14] : memref<4x1x256xf32, #tpu.memory_space<vmem>>, vector<1x1x256xf32>
    %9 = vector.shape_cast %8 : vector<1x1x256xf32> to vector<1x256xf32>
    %c3 = arith.constant 3 : index
    %c0_15 = arith.constant 0 : index
    %c0_16 = arith.constant 0 : index
    %10 = vector.load %arg7[%c3, %c0_15, %c0_16] : memref<4x1x256xf32, #tpu.memory_space<vmem>>, vector<1x1x256xf32>
    %11 = vector.shape_cast %10 : vector<1x1x256xf32> to vector<1x256xf32>
    %c0_17 = arith.constant 0 : index
    %c0_18 = arith.constant 0 : index
    %c0_19 = arith.constant 0 : index
    %12 = vector.load %arg2[%c0_17, %c0_18, %c0_19] : memref<2x4x256xf32, #tpu.memory_space<vmem>>, vector<1x4x256xf32>
    %13 = vector.shape_cast %12 : vector<1x4x256xf32> to vector<4x256xf32>
    %14 = vector.extract_strided_slice %0 {offsets = [0, 0], sizes = [8, 1], strides = [1, 1]} : vector<8x4xf32> to vector<8x1xf32>
    %15 = vector.extract_strided_slice %13 {offsets = [0, 0], sizes = [1, 256], strides = [1, 1]} : vector<4x256xf32> to vector<1x256xf32>
    %16 = vector.broadcast %14 : vector<8x1xf32> to vector<8x256xf32>
    %17 = vector.broadcast %15 : vector<1x256xf32> to vector<8x256xf32>
    %18 = arith.mulf %16, %17 : vector<8x256xf32>
    %19 = vector.broadcast %1 : vector<8x1xf32> to vector<8x256xf32>
    %20 = arith.addf %18, %19 : vector<8x256xf32>
    %21 = vector.extract_strided_slice %0 {offsets = [0, 1], sizes = [8, 1], strides = [1, 1]} : vector<8x4xf32> to vector<8x1xf32>
    %22 = vector.extract_strided_slice %13 {offsets = [1, 0], sizes = [1, 256], strides = [1, 1]} : vector<4x256xf32> to vector<1x256xf32>
    %23 = vector.broadcast %21 : vector<8x1xf32> to vector<8x256xf32>
    %24 = vector.broadcast %22 : vector<1x256xf32> to vector<8x256xf32>
    %25 = arith.mulf %23, %24 : vector<8x256xf32>
    %26 = arith.addf %20, %25 : vector<8x256xf32>
    %27 = vector.extract_strided_slice %0 {offsets = [0, 2], sizes = [8, 1], strides = [1, 1]} : vector<8x4xf32> to vector<8x1xf32>
    %28 = vector.extract_strided_slice %13 {offsets = [2, 0], sizes = [1, 256], strides = [1, 1]} : vector<4x256xf32> to vector<1x256xf32>
    %29 = vector.broadcast %27 : vector<8x1xf32> to vector<8x256xf32>
    %30 = vector.broadcast %28 : vector<1x256xf32> to vector<8x256xf32>
    %31 = arith.mulf %29, %30 : vector<8x256xf32>
    %32 = arith.addf %26, %31 : vector<8x256xf32>
    %33 = vector.extract_strided_slice %0 {offsets = [0, 3], sizes = [8, 1], strides = [1, 1]} : vector<8x4xf32> to vector<8x1xf32>
    %34 = vector.extract_strided_slice %13 {offsets = [3, 0], sizes = [1, 256], strides = [1, 1]} : vector<4x256xf32> to vector<1x256xf32>
    %35 = vector.broadcast %33 : vector<8x1xf32> to vector<8x256xf32>
    %36 = vector.broadcast %34 : vector<1x256xf32> to vector<8x256xf32>
    %37 = arith.mulf %35, %36 : vector<8x256xf32>
    %38 = arith.addf %32, %37 : vector<8x256xf32>
    %39 = vector.broadcast %5 : vector<1x256xf32> to vector<8x256xf32>
    %40 = arith.mulf %38, %39 : vector<8x256xf32>
    %c1_i32 = arith.constant 1 : i32
    %41 = tpu.dynamic_rotate %40 by %c1_i32 dim 1 : vector<8x256xf32>, i32 -> vector<8x256xf32>
    %42 = vector.broadcast %7 : vector<1x256xf32> to vector<8x256xf32>
    %43 = arith.mulf %38, %42 : vector<8x256xf32>
    %c255_i32 = arith.constant 255 : i32
    %44 = tpu.dynamic_rotate %43 by %c255_i32 dim 1 : vector<8x256xf32>, i32 -> vector<8x256xf32>
    %45 = vector.extract_strided_slice %2 {offsets = [0, 0, 0], sizes = [1, 8, 1], strides = [1, 1, 1]} : vector<9x8x1xf32> to vector<1x8x1xf32>
    %46 = vector.shape_cast %45 : vector<1x8x1xf32> to vector<8x1xf32>
    %47 = vector.broadcast %46 : vector<8x1xf32> to vector<8x256xf32>
    %48 = arith.mulf %47, %41 : vector<8x256xf32>
    %49 = vector.extract_strided_slice %2 {offsets = [1, 0, 0], sizes = [1, 8, 1], strides = [1, 1, 1]} : vector<9x8x1xf32> to vector<1x8x1xf32>
    %50 = vector.shape_cast %49 : vector<1x8x1xf32> to vector<8x1xf32>
    %51 = vector.broadcast %50 : vector<8x1xf32> to vector<8x256xf32>
    %52 = arith.mulf %51, %38 : vector<8x256xf32>
    %53 = arith.addf %48, %52 : vector<8x256xf32>
    %54 = vector.extract_strided_slice %2 {offsets = [2, 0, 0], sizes = [1, 8, 1], strides = [1, 1, 1]} : vector<9x8x1xf32> to vector<1x8x1xf32>
    %55 = vector.shape_cast %54 : vector<1x8x1xf32> to vector<8x1xf32>
    %56 = vector.broadcast %55 : vector<8x1xf32> to vector<8x256xf32>
    %57 = arith.mulf %56, %44 : vector<8x256xf32>
    %58 = arith.addf %53, %57 : vector<8x256xf32>
    %59 = vector.extract_strided_slice %2 {offsets = [3, 0, 0], sizes = [1, 8, 1], strides = [1, 1, 1]} : vector<9x8x1xf32> to vector<1x8x1xf32>
    %60 = vector.shape_cast %59 : vector<1x8x1xf32> to vector<8x1xf32>
    %61 = vector.broadcast %60 : vector<8x1xf32> to vector<8x256xf32>
    %62 = arith.mulf %61, %41 : vector<8x256xf32>
    %63 = vector.extract_strided_slice %2 {offsets = [4, 0, 0], sizes = [1, 8, 1], strides = [1, 1, 1]} : vector<9x8x1xf32> to vector<1x8x1xf32>
    %64 = vector.shape_cast %63 : vector<1x8x1xf32> to vector<8x1xf32>
    %65 = vector.broadcast %64 : vector<8x1xf32> to vector<8x256xf32>
    %66 = arith.mulf %65, %38 : vector<8x256xf32>
    %67 = arith.addf %62, %66 : vector<8x256xf32>
    %68 = vector.extract_strided_slice %2 {offsets = [5, 0, 0], sizes = [1, 8, 1], strides = [1, 1, 1]} : vector<9x8x1xf32> to vector<1x8x1xf32>
    %69 = vector.shape_cast %68 : vector<1x8x1xf32> to vector<8x1xf32>
    %70 = vector.broadcast %69 : vector<8x1xf32> to vector<8x256xf32>
    %71 = arith.mulf %70, %44 : vector<8x256xf32>
    %72 = arith.addf %67, %71 : vector<8x256xf32>
    %73 = vector.extract_strided_slice %2 {offsets = [6, 0, 0], sizes = [1, 8, 1], strides = [1, 1, 1]} : vector<9x8x1xf32> to vector<1x8x1xf32>
    %74 = vector.shape_cast %73 : vector<1x8x1xf32> to vector<8x1xf32>
    %75 = vector.broadcast %74 : vector<8x1xf32> to vector<8x256xf32>
    %76 = arith.mulf %75, %41 : vector<8x256xf32>
    %77 = vector.extract_strided_slice %2 {offsets = [7, 0, 0], sizes = [1, 8, 1], strides = [1, 1, 1]} : vector<9x8x1xf32> to vector<1x8x1xf32>
    %78 = vector.shape_cast %77 : vector<1x8x1xf32> to vector<8x1xf32>
    %79 = vector.broadcast %78 : vector<8x1xf32> to vector<8x256xf32>
    %80 = arith.mulf %79, %38 : vector<8x256xf32>
    %81 = arith.addf %76, %80 : vector<8x256xf32>
    %82 = vector.extract_strided_slice %2 {offsets = [8, 0, 0], sizes = [1, 8, 1], strides = [1, 1, 1]} : vector<9x8x1xf32> to vector<1x8x1xf32>
    %83 = vector.shape_cast %82 : vector<1x8x1xf32> to vector<8x1xf32>
    %84 = vector.broadcast %83 : vector<8x1xf32> to vector<8x256xf32>
    %85 = arith.mulf %84, %44 : vector<8x256xf32>
    %86 = arith.addf %81, %85 : vector<8x256xf32>
    %87 = vector.broadcast %3 : vector<8x1xf32> to vector<8x256xf32>
    %88 = arith.addf %72, %87 : vector<8x256xf32>
    %c16_i32 = arith.constant 16 : i32
    %89 = tpu.dynamic_rotate %58 by %c16_i32 dim 1 : vector<8x256xf32>, i32 -> vector<8x256xf32>
    %90 = vector.broadcast %9 : vector<1x256xf32> to vector<8x256xf32>
    %91 = arith.mulf %90, %89 : vector<8x256xf32>
    %92 = arith.addf %88, %91 : vector<8x256xf32>
    %c240_i32 = arith.constant 240 : i32
    %93 = tpu.dynamic_rotate %86 by %c240_i32 dim 1 : vector<8x256xf32>, i32 -> vector<8x256xf32>
    %94 = vector.broadcast %11 : vector<1x256xf32> to vector<8x256xf32>
    %95 = arith.mulf %94, %93 : vector<8x256xf32>
    %96 = arith.addf %92, %95 : vector<8x256xf32>
    %cst = arith.constant dense<0.000000e+00> : vector<8xf32>
    %97 = vector.multi_reduction <add>, %96, %cst [1] : vector<8x256xf32> to vector<8xf32>
    %98 = vector.shape_cast %97 : vector<8xf32> to vector<8x1xf32>
    %cst_20 = arith.constant 3.906250e-03 : f32
    %99 = vector.broadcast %cst_20 : f32 to vector<8x1xf32>
    %100 = arith.mulf %98, %99 : vector<8x1xf32>
    %101 = vector.broadcast %100 : vector<8x1xf32> to vector<8x256xf32>
    %102 = arith.subf %96, %101 : vector<8x256xf32>
    %103 = arith.mulf %102, %102 : vector<8x256xf32>
    %cst_21 = arith.constant dense<0.000000e+00> : vector<8xf32>
    %104 = vector.multi_reduction <add>, %103, %cst_21 [1] : vector<8x256xf32> to vector<8xf32>
    %105 = vector.shape_cast %104 : vector<8xf32> to vector<8x1xf32>
    %cst_22 = arith.constant 3.906250e-03 : f32
    %106 = vector.broadcast %cst_22 : f32 to vector<8x1xf32>
    %107 = arith.mulf %105, %106 : vector<8x1xf32>
    %cst_23 = arith.constant 9.99999974E-6 : f32
    %108 = vector.broadcast %cst_23 : f32 to vector<8x1xf32>
    %109 = arith.addf %107, %108 : vector<8x1xf32>
    %110 = math.rsqrt %109 : vector<8x1xf32>
    %111 = vector.broadcast %110 : vector<8x1xf32> to vector<8x256xf32>
    %112 = arith.mulf %102, %111 : vector<8x256xf32>
    %cst_24 = arith.constant 9.99999974E-6 : f32
    %113 = vector.broadcast %cst_24 : f32 to vector<8x1xf32>
    %114 = arith.addf %107, %113 : vector<8x1xf32>
    %115 = arith.divf %107, %114 : vector<8x1xf32>
    %116 = arith.truncf %112 : vector<8x256xf32> to vector<8x256xbf16>
    %c0_25 = arith.constant 0 : index
    %c0_26 = arith.constant 0 : index
    %c0_27 = arith.constant 0 : index
    %117 = vector.load %arg8[%c0_25, %c0_26, %c0_27] : memref<2x8x256xbf16, #tpu.memory_space<vmem>>, vector<1x8x256xbf16>
    %118 = vector.shape_cast %117 : vector<1x8x256xbf16> to vector<8x256xbf16>
    %119 = vector.shape_cast %116 : vector<8x256xbf16> to vector<1x8x256xbf16>
    tpu.vector_store %arg8[%c0_25, %c0_26, %c0_27], %119 {strides = array<i32>} : memref<2x8x256xbf16, #tpu.memory_space<vmem>>, vector<1x8x256xbf16>,
    %c0_28 = arith.constant 0 : index
    %c0_29 = arith.constant 0 : index
    %c0_30 = arith.constant 0 : index
    %120 = vector.load %arg9[%c0_28, %c0_29, %c0_30] : memref<2x8x1xf32, #tpu.memory_space<vmem>>, vector<1x8x1xf32>
    %121 = vector.shape_cast %120 : vector<1x8x1xf32> to vector<8x1xf32>
    %122 = vector.shape_cast %115 : vector<8x1xf32> to vector<1x8x1xf32>
    tpu.vector_store %arg9[%c0_28, %c0_29, %c0_30], %122 {strides = array<i32>} : memref<2x8x1xf32, #tpu.memory_space<vmem>>, vector<1x8x1xf32>,
    %c1_31 = arith.constant 1 : index
    %c0_32 = arith.constant 0 : index
    %c0_33 = arith.constant 0 : index
    %123 = vector.load %arg2[%c1_31, %c0_32, %c0_33] : memref<2x4x256xf32, #tpu.memory_space<vmem>>, vector<1x4x256xf32>
    %124 = vector.shape_cast %123 : vector<1x4x256xf32> to vector<4x256xf32>
    %125 = vector.extract_strided_slice %0 {offsets = [0, 0], sizes = [8, 1], strides = [1, 1]} : vector<8x4xf32> to vector<8x1xf32>
    %126 = vector.extract_strided_slice %124 {offsets = [0, 0], sizes = [1, 256], strides = [1, 1]} : vector<4x256xf32> to vector<1x256xf32>
    %127 = vector.broadcast %125 : vector<8x1xf32> to vector<8x256xf32>
    %128 = vector.broadcast %126 : vector<1x256xf32> to vector<8x256xf32>
    %129 = arith.mulf %127, %128 : vector<8x256xf32>
    %130 = vector.broadcast %1 : vector<8x1xf32> to vector<8x256xf32>
    %131 = arith.addf %129, %130 : vector<8x256xf32>
    %132 = vector.extract_strided_slice %0 {offsets = [0, 1], sizes = [8, 1], strides = [1, 1]} : vector<8x4xf32> to vector<8x1xf32>
    %133 = vector.extract_strided_slice %124 {offsets = [1, 0], sizes = [1, 256], strides = [1, 1]} : vector<4x256xf32> to vector<1x256xf32>
    %134 = vector.broadcast %132 : vector<8x1xf32> to vector<8x256xf32>
    %135 = vector.broadcast %133 : vector<1x256xf32> to vector<8x256xf32>
    %136 = arith.mulf %134, %135 : vector<8x256xf32>
    %137 = arith.addf %131, %136 : vector<8x256xf32>
    %138 = vector.extract_strided_slice %0 {offsets = [0, 2], sizes = [8, 1], strides = [1, 1]} : vector<8x4xf32> to vector<8x1xf32>
    %139 = vector.extract_strided_slice %124 {offsets = [2, 0], sizes = [1, 256], strides = [1, 1]} : vector<4x256xf32> to vector<1x256xf32>
    %140 = vector.broadcast %138 : vector<8x1xf32> to vector<8x256xf32>
    %141 = vector.broadcast %139 : vector<1x256xf32> to vector<8x256xf32>
    %142 = arith.mulf %140, %141 : vector<8x256xf32>
    %143 = arith.addf %137, %142 : vector<8x256xf32>
    %144 = vector.extract_strided_slice %0 {offsets = [0, 3], sizes = [8, 1], strides = [1, 1]} : vector<8x4xf32> to vector<8x1xf32>
    %145 = vector.extract_strided_slice %124 {offsets = [3, 0], sizes = [1, 256], strides = [1, 1]} : vector<4x256xf32> to vector<1x256xf32>
    %146 = vector.broadcast %144 : vector<8x1xf32> to vector<8x256xf32>
    %147 = vector.broadcast %145 : vector<1x256xf32> to vector<8x256xf32>
    %148 = arith.mulf %146, %147 : vector<8x256xf32>
    %149 = arith.addf %143, %148 : vector<8x256xf32>
    %150 = vector.broadcast %5 : vector<1x256xf32> to vector<8x256xf32>
    %151 = arith.mulf %149, %150 : vector<8x256xf32>
    %c1_i32_34 = arith.constant 1 : i32
    %152 = tpu.dynamic_rotate %151 by %c1_i32_34 dim 1 : vector<8x256xf32>, i32 -> vector<8x256xf32>
    %153 = vector.broadcast %7 : vector<1x256xf32> to vector<8x256xf32>
    %154 = arith.mulf %149, %153 : vector<8x256xf32>
    %c255_i32_35 = arith.constant 255 : i32
    %155 = tpu.dynamic_rotate %154 by %c255_i32_35 dim 1 : vector<8x256xf32>, i32 -> vector<8x256xf32>
    %156 = vector.extract_strided_slice %2 {offsets = [0, 0, 0], sizes = [1, 8, 1], strides = [1, 1, 1]} : vector<9x8x1xf32> to vector<1x8x1xf32>
    %157 = vector.shape_cast %156 : vector<1x8x1xf32> to vector<8x1xf32>
    %158 = vector.broadcast %157 : vector<8x1xf32> to vector<8x256xf32>
    %159 = arith.mulf %158, %152 : vector<8x256xf32>
    %160 = vector.extract_strided_slice %2 {offsets = [1, 0, 0], sizes = [1, 8, 1], strides = [1, 1, 1]} : vector<9x8x1xf32> to vector<1x8x1xf32>
    %161 = vector.shape_cast %160 : vector<1x8x1xf32> to vector<8x1xf32>
    %162 = vector.broadcast %161 : vector<8x1xf32> to vector<8x256xf32>
    %163 = arith.mulf %162, %149 : vector<8x256xf32>
    %164 = arith.addf %159, %163 : vector<8x256xf32>
    %165 = vector.extract_strided_slice %2 {offsets = [2, 0, 0], sizes = [1, 8, 1], strides = [1, 1, 1]} : vector<9x8x1xf32> to vector<1x8x1xf32>
    %166 = vector.shape_cast %165 : vector<1x8x1xf32> to vector<8x1xf32>
    %167 = vector.broadcast %166 : vector<8x1xf32> to vector<8x256xf32>
    %168 = arith.mulf %167, %155 : vector<8x256xf32>
    %169 = arith.addf %164, %168 : vector<8x256xf32>
    %170 = vector.extract_strided_slice %2 {offsets = [3, 0, 0], sizes = [1, 8, 1], strides = [1, 1, 1]} : vector<9x8x1xf32> to vector<1x8x1xf32>
    %171 = vector.shape_cast %170 : vector<1x8x1xf32> to vector<8x1xf32>
    %172 = vector.broadcast %171 : vector<8x1xf32> to vector<8x256xf32>
    %173 = arith.mulf %172, %152 : vector<8x256xf32>
    %174 = vector.extract_strided_slice %2 {offsets = [4, 0, 0], sizes = [1, 8, 1], strides = [1, 1, 1]} : vector<9x8x1xf32> to vector<1x8x1xf32>
    %175 = vector.shape_cast %174 : vector<1x8x1xf32> to vector<8x1xf32>
    %176 = vector.broadcast %175 : vector<8x1xf32> to vector<8x256xf32>
    %177 = arith.mulf %176, %149 : vector<8x256xf32>
    %178 = arith.addf %173, %177 : vector<8x256xf32>
    %179 = vector.extract_strided_slice %2 {offsets = [5, 0, 0], sizes = [1, 8, 1], strides = [1, 1, 1]} : vector<9x8x1xf32> to vector<1x8x1xf32>
    %180 = vector.shape_cast %179 : vector<1x8x1xf32> to vector<8x1xf32>
    %181 = vector.broadcast %180 : vector<8x1xf32> to vector<8x256xf32>
    %182 = arith.mulf %181, %155 : vector<8x256xf32>
    %183 = arith.addf %178, %182 : vector<8x256xf32>
    %184 = vector.extract_strided_slice %2 {offsets = [6, 0, 0], sizes = [1, 8, 1], strides = [1, 1, 1]} : vector<9x8x1xf32> to vector<1x8x1xf32>
    %185 = vector.shape_cast %184 : vector<1x8x1xf32> to vector<8x1xf32>
    %186 = vector.broadcast %185 : vector<8x1xf32> to vector<8x256xf32>
    %187 = arith.mulf %186, %152 : vector<8x256xf32>
    %188 = vector.extract_strided_slice %2 {offsets = [7, 0, 0], sizes = [1, 8, 1], strides = [1, 1, 1]} : vector<9x8x1xf32> to vector<1x8x1xf32>
    %189 = vector.shape_cast %188 : vector<1x8x1xf32> to vector<8x1xf32>
    %190 = vector.broadcast %189 : vector<8x1xf32> to vector<8x256xf32>
    %191 = arith.mulf %190, %149 : vector<8x256xf32>
    %192 = arith.addf %187, %191 : vector<8x256xf32>
    %193 = vector.extract_strided_slice %2 {offsets = [8, 0, 0], sizes = [1, 8, 1], strides = [1, 1, 1]} : vector<9x8x1xf32> to vector<1x8x1xf32>
    %194 = vector.shape_cast %193 : vector<1x8x1xf32> to vector<8x1xf32>
    %195 = vector.broadcast %194 : vector<8x1xf32> to vector<8x256xf32>
    %196 = arith.mulf %195, %155 : vector<8x256xf32>
    %197 = arith.addf %192, %196 : vector<8x256xf32>
    %198 = vector.broadcast %3 : vector<8x1xf32> to vector<8x256xf32>
    %199 = arith.addf %183, %198 : vector<8x256xf32>
    %c16_i32_36 = arith.constant 16 : i32
    %200 = tpu.dynamic_rotate %169 by %c16_i32_36 dim 1 : vector<8x256xf32>, i32 -> vector<8x256xf32>
    %201 = vector.broadcast %9 : vector<1x256xf32> to vector<8x256xf32>
    %202 = arith.mulf %201, %200 : vector<8x256xf32>
    %203 = arith.addf %199, %202 : vector<8x256xf32>
    %c240_i32_37 = arith.constant 240 : i32
    %204 = tpu.dynamic_rotate %197 by %c240_i32_37 dim 1 : vector<8x256xf32>, i32 -> vector<8x256xf32>
    %205 = vector.broadcast %11 : vector<1x256xf32> to vector<8x256xf32>
    %206 = arith.mulf %205, %204 : vector<8x256xf32>
    %207 = arith.addf %203, %206 : vector<8x256xf32>
    %cst_38 = arith.constant dense<0.000000e+00> : vector<8xf32>
    %208 = vector.multi_reduction <add>, %207, %cst_38 [1] : vector<8x256xf32> to vector<8xf32>
    %209 = vector.shape_cast %208 : vector<8xf32> to vector<8x1xf32>
    %cst_39 = arith.constant 3.906250e-03 : f32
    %210 = vector.broadcast %cst_39 : f32 to vector<8x1xf32>
    %211 = arith.mulf %209, %210 : vector<8x1xf32>
    %212 = vector.broadcast %211 : vector<8x1xf32> to vector<8x256xf32>
    %213 = arith.subf %207, %212 : vector<8x256xf32>
    %214 = arith.mulf %213, %213 : vector<8x256xf32>
    %cst_40 = arith.constant dense<0.000000e+00> : vector<8xf32>
    %215 = vector.multi_reduction <add>, %214, %cst_40 [1] : vector<8x256xf32> to vector<8xf32>
    %216 = vector.shape_cast %215 : vector<8xf32> to vector<8x1xf32>
    %cst_41 = arith.constant 3.906250e-03 : f32
    %217 = vector.broadcast %cst_41 : f32 to vector<8x1xf32>
    %218 = arith.mulf %216, %217 : vector<8x1xf32>
    %cst_42 = arith.constant 9.99999974E-6 : f32
    %219 = vector.broadcast %cst_42 : f32 to vector<8x1xf32>
    %220 = arith.addf %218, %219 : vector<8x1xf32>
    %221 = math.rsqrt %220 : vector<8x1xf32>
    %222 = vector.broadcast %221 : vector<8x1xf32> to vector<8x256xf32>
    %223 = arith.mulf %213, %222 : vector<8x256xf32>
    %cst_43 = arith.constant 9.99999974E-6 : f32
    %224 = vector.broadcast %cst_43 : f32 to vector<8x1xf32>
    %225 = arith.addf %218, %224 : vector<8x1xf32>
    %226 = arith.divf %218, %225 : vector<8x1xf32>
    %227 = arith.truncf %223 : vector<8x256xf32> to vector<8x256xbf16>
    %c1_44 = arith.constant 1 : index
    %c0_45 = arith.constant 0 : index
    %c0_46 = arith.constant 0 : index
    %228 = vector.load %arg8[%c1_44, %c0_45, %c0_46] : memref<2x8x256xbf16, #tpu.memory_space<vmem>>, vector<1x8x256xbf16>
    %229 = vector.shape_cast %228 : vector<1x8x256xbf16> to vector<8x256xbf16>
    %230 = vector.shape_cast %227 : vector<8x256xbf16> to vector<1x8x256xbf16>
    tpu.vector_store %arg8[%c1_44, %c0_45, %c0_46], %230 {strides = array<i32>} : memref<2x8x256xbf16, #tpu.memory_space<vmem>>, vector<1x8x256xbf16>,
    %c1_47 = arith.constant 1 : index
    %c0_48 = arith.constant 0 : index
    %c0_49 = arith.constant 0 : index
    %231 = vector.load %arg9[%c1_47, %c0_48, %c0_49] : memref<2x8x1xf32, #tpu.memory_space<vmem>>, vector<1x8x1xf32>
    %232 = vector.shape_cast %231 : vector<1x8x1xf32> to vector<8x1xf32>
    %233 = vector.shape_cast %226 : vector<8x1xf32> to vector<1x8x1xf32>
    tpu.vector_store %arg9[%c1_47, %c0_48, %c0_49], %233 {strides = array<i32>} : memref<2x8x1xf32, #tpu.memory_space<vmem>>, vector<1x8x1xf32>,
    return
  }
  func.func @transform_0(%arg0: i32, %arg1: i32) -> (i32, i32, i32) {
    %c0_i32 = arith.constant 0 : i32
    %c0_i32_0 = arith.constant 0 : i32
    %c0_i32_1 = arith.constant 0 : i32
    return %arg0, %c0_i32, %c0_i32_0 : i32, i32, i32
  }
  func.func @transform_1(%arg0: i32, %arg1: i32) -> (i32, i32) {
    %c0_i32 = arith.constant 0 : i32
    %c0_i32_0 = arith.constant 0 : i32
    return %arg1, %c0_i32 : i32, i32
  }
  func.func @transform_2(%arg0: i32, %arg1: i32) -> (i32, i32) {
    %c0_i32 = arith.constant 0 : i32
    %c0_i32_0 = arith.constant 0 : i32
    return %arg1, %c0_i32 : i32, i32
  }
  func.func @transform_3(%arg0: i32, %arg1: i32) -> (i32, i32, i32) {
    %c0_i32 = arith.constant 0 : i32
    %c0_i32_0 = arith.constant 0 : i32
    %c0_i32_1 = arith.constant 0 : i32
    return %c0_i32, %arg1, %c0_i32_0 : i32, i32, i32
  }
  func.func @transform_4(%arg0: i32, %arg1: i32) -> (i32, i32) {
    %c0_i32 = arith.constant 0 : i32
    %c0_i32_0 = arith.constant 0 : i32
    return %arg1, %c0_i32 : i32, i32
  }
  func.func @transform_5(%arg0: i32, %arg1: i32) -> (i32, i32, i32) {
    %c0_i32 = arith.constant 0 : i32
    %c0_i32_0 = arith.constant 0 : i32
    %c0_i32_1 = arith.constant 0 : i32
    %c0_i32_2 = arith.constant 0 : i32
    return %c0_i32, %c0_i32_0, %c0_i32_1 : i32, i32, i32
  }
  func.func @transform_6(%arg0: i32, %arg1: i32) -> (i32, i32, i32) {
    %c0_i32 = arith.constant 0 : i32
    %c0_i32_0 = arith.constant 0 : i32
    return %arg0, %arg1, %c0_i32 : i32, i32, i32
  }
  func.func @transform_7(%arg0: i32, %arg1: i32) -> (i32, i32, i32) {
    %c0_i32 = arith.constant 0 : i32
    %c0_i32_0 = arith.constant 0 : i32
    return %arg0, %arg1, %c0_i32 : i32, i32, i32
  }
}

</mosaic_0001>

<bundles_post_ra>
// kernel: _forward_impl.5
= control target key start
LH: loop header
LB: loop body
LE: loop exit
PB: predicated region body
PF: predicated region fallthrough
CT: control target
= control target key end

     0   :  { %v54_v0 = vmov 0   ;;  %s99_s1 = inlined_call_operand.vmem [shape: f32[8,1], index: 1, kind: input, shape index: {}]   ;;  %s100_s2 = inlined_call_operand.vmem [shape: f32[8,1], index: 2, kind: input, shape index: {}]   ;;  %s101_s0 = inlined_call_operand.vmem [shape: bf16[2,8,256], index: 0, kind: input, shape index: {}]   ;;  %s102_s3 = inlined_call_operand.vmem [shape: f32[2,8,256], index: 3, kind: output, shape index: {}]  }
   0x1   :  { %53 = vset.pattern.permute.xlu0 %v54_v0  ;;  %v20_v1 = vld [vmem:[%s99_s1] sm:$0xff]  ;;  %v15_v4 = vld [vmem:[%s101_s0 + $0x8] sm:$0xff] }
   0x2   :  { %23 = vperm.xlu0 %53, %v20_v1   ;;  %v30_v2 = vld [vmem:[%s100_s2] sm:$0xff]  ;;  %v18_v7 = vunpack.c.l.bf16 %v15_v4  ;;  %v19_v8 = vunpack.c.h.bf16 %v15_v4 }
   0x3   :  { %v14_v3 = vld [vmem:[%s101_s0] sm:$0xff] }
   0x4   :  { %v16_v5 = vunpack.c.l.bf16 %v14_v3  ;;  %v17_v6 = vunpack.c.h.bf16 %v14_v3 }
   0x6   :  { %33 = vperm.xlu0 %53, %v30_v2  }
  0x81   :  { %v24_v9 = vpop.permute.xlu0 %23 }
  0x82   :  { %v26_v10 = vmul.f32 %v24_v9, %v16_v5  ;;  %v27_v11 = vmul.f32 %v24_v9, %v17_v6  ;;  %v28_v12 = vmul.f32 %v24_v9, %v18_v7  ;;  %v29_v13 = vmul.f32 %v24_v9, %v19_v8 }
  0x85   :  { %v34_v14 = vpop.permute.xlu0 %33 }
  0x86   :  { %v36_v15 = vadd.f32 %v34_v14, %v26_v10  ;;  %v37_v16 = vadd.f32 %v34_v14, %v27_v11  ;;  %v38_v17 = vadd.f32 %v34_v14, %v28_v12  ;;  %v39_v18 = vadd.f32 %v34_v14, %v29_v13 }
  0x88   :  { %v40_v19 = vmax.f32 %v36_v15, 0.0  ;;  %v41_v20 = vmax.f32 %v37_v16, 0.0  ;;  %v42_v21 = vmax.f32 %v38_v17, 0.0  ;;  %v43_v22 = vmax.f32 %v39_v18, 0.0 }
  0x8a   :  { %44 = vst [vmem:[%s102_s3] sm:$0xff] %v40_v19  ;;  %45 = vst [vmem:[%s102_s3 + $0x8] sm:$0xff] %v41_v20 }
  0x8b   :  { %46 = vst [vmem:[%s102_s3 + $0x10] sm:$0xff] %v42_v21  ;;  %47 = vst [vmem:[%s102_s3 + $0x18] sm:$0xff] %v43_v22 }

// kernel: _forward_impl.3
= control target key start
LH: loop header
LB: loop body
LE: loop exit
PB: predicated region body
PF: predicated region fallthrough
CT: control target
= control target key end

     0   :  { %v582_v0 = vmov 1   ;;  %v583_v1 = vmov 0   ;;  %v584_v4 = vmov 2   ;;  %v585_v6 = vmov 3   ;;  %s586_s22 = smov 1   ;;  %s587_s23 = smov 127   ;;  %s818_s1 = inlined_call_operand.vmem [shape: f32[8,4], index: 1, kind: input, shape index: {}]   ;;  %s819_s2 = inlined_call_operand.vmem [shape: f32[8,1], index: 2, kind: input, shape index: {}]   ;;  %s820_s3 = inlined_call_operand.vmem [shape: f32[9,8,1], index: 3, kind: input, shape index: {}]   ;;  %s821_s0 = inlined_call_operand.vmem [shape: f32[2,4,256], index: 0, kind: input, shape index: {}]   ;;  %s822_s5 = inlined_call_operand.vmem [shape: f32[4,1,256], index: 5, kind: input, shape index: {}]   ;;  %s823_s4 = inlined_call_operand.vmem [shape: f32[8,1], index: 4, kind: input, shape index: {}]   ;;  %s824_s7 = inlined_call_operand.vmem [shape: f32[2,8,1], index: 7, kind: output, shape index: {1}]   ;;  %s825_s6 = inlined_call_operand.vmem [shape: bf16[2,8,256], index: 6, kind: output, shape index: {0}]  }
   0x1   :  { %569 = vset.pattern.permute.xlu1 %v582_v0  ;;  %568 = vset.pattern.permute.xlu0 %v583_v1  ;;  %v25_v2 = vld [vmem:[%s818_s1] sm:$0xff]  ;;  %v28_v7 = vld [vmem:[%s820_s3 + $0x8] sm:$0xff]  ;;  %v29_v8 = vld [vmem:[%s820_s3 + $0x10] sm:$0xff]  ;;  %v51_v12 = vlaneseq  ;;  %vm351_vm4 = vcmask 7168  }
   0x2   :  { %79 = vperm.xlu1 %569, %v25_v2   ;;  %47 = vperm.xlu0 %568, %v25_v2   ;;  %v26_v3 = vld [vmem:[%s819_s2] sm:$0xff]  ;;  %v33_v9 = vld [vmem:[%s820_s3 + $0x30] sm:$0xff]  ;;  %v34_v11 = vld [vmem:[%s820_s3 + $0x38] sm:$0xff] }
   0x3   :  { %v27_v5 = vld [vmem:[%s820_s3] sm:$0xff]  ;;  %v52_v13 = vshrl.u32 %v51_v12, 7  ;;  %v554_v17 = vld [vmem:[%s821_s0 + $0x8] sm:$0xff] }
   0x4   :  { %v35_v10 = vld [vmem:[%s820_s3 + $0x40] sm:$0xff] }
   0x5   :  { %v655_v14 = vsub.s32 0, %v52_v13  ;;  %v57_v15 = vsub.s32 4, %v52_v13  ;;  %v44_v16 = vld [vmem:[%s821_s0] sm:$0xff]  ;;  %v663_v18 = vsub.s32 1, %v52_v13  ;;  %v88_v19 = vsub.s32 5, %v52_v13 }
   0x6   :  { %570 = vset.pattern.permute.xlu1 %v584_v4  ;;  %73 = vperm.xlu0 %568, %v26_v3   ;;  %v110_v20 = vsub.s32 2, %v52_v13  ;;  %v114_v21 = vsub.s32 6, %v52_v13  ;;  %v665_v22 = vsub.s32 3, %v52_v13  ;;  %v140_v23 = vsub.s32 7, %v52_v13 }
   0x7   :  { %105 = vperm.xlu1 %570, %v25_v2   ;;  %v54_v24 = vrot.slane %v44_v16, %v655_v14  ;;  %v58_v25 = vrot.slane %v44_v16, %v57_v15  ;;  %v359_v26 = vrot.slane %v554_v17, %v655_v14  ;;  %v363_v27 = vrot.slane %v554_v17, %v57_v15 }
   0x8   :  { %v85_v28 = vrot.slane %v44_v16, %v663_v18  ;;  %v89_v29 = vrot.slane %v44_v16, %v88_v19  ;;  %v381_v30 = vrot.slane %v554_v17, %v663_v18  ;;  %v385_v31 = vrot.slane %v554_v17, %v88_v19 }
   0x9   :  { %v111_v32 = vrot.slane %v44_v16, %v110_v20  ;;  %v115_v33 = vrot.slane %v44_v16, %v114_v21  ;;  %v403_v34 = vrot.slane %v554_v17, %v110_v20  ;;  %v407_v35 = vrot.slane %v554_v17, %v114_v21 }
   0xa   :  { %571 = vset.pattern.permute.xlu0 %v585_v6  ;;  %v137_v36 = vrot.slane %v44_v16, %v665_v22  ;;  %v141_v37 = vrot.slane %v44_v16, %v140_v23  ;;  %v425_v38 = vrot.slane %v554_v17, %v665_v22  ;;  %v429_v39 = vrot.slane %v554_v17, %v140_v23 }
   0xb   :  { %572 = vset.pattern.permute.xlu1 %v583_v1  ;;  %131 = vperm.xlu0 %571, %v25_v2   ;;  %v64_v40 = vrot.slane %v54_v24, %v655_v14  ;;  %v68_v41 = vrot.slane %v58_v25, %v655_v14  ;;  %v369_v42 = vrot.slane %v359_v26, %v655_v14 }
   0xc   :  { %200 = vperm.xlu1 %572, %v27_v5   ;;  %v373_v43 = vrot.slane %v363_v27, %v655_v14  ;;  %v95_v46 = vrot.slane %v85_v28, %v663_v18  ;;  %v99_v47 = vrot.slane %v89_v29, %v663_v18  ;;  %v391_v48 = vrot.slane %v381_v30, %v663_v18 }
   0xd   :  { %v395_v49 = vrot.slane %v385_v31, %v663_v18  ;;  %v121_v50 = vrot.slane %v111_v32, %v110_v20  ;;  %v125_v51 = vrot.slane %v115_v33, %v110_v20  ;;  %v413_v52 = vrot.slane %v403_v34, %v110_v20 }
   0xe   :  { %v417_v53 = vrot.slane %v407_v35, %v110_v20  ;;  %v147_v54 = vrot.slane %v137_v36, %v665_v22  ;;  %v151_v55 = vrot.slane %v141_v37, %v665_v22  ;;  %v435_v56 = vrot.slane %v425_v38, %v665_v22  ;;  %v550_v37 = vld [vmem:[%s822_s5 + $0x2] sm:$0x3] }
   0xf   :  { %573 = vset.pattern.permute.xlu0 %v583_v1  ;;  %v439_v57 = vrot.slane %v429_v39, %v665_v22 }
  0x10   :  { %207 = vperm.xlu1 %572, %v28_v7   ;;  %216 = vperm.xlu0 %573, %v29_v8   ;;  %v37_v8 = vld [vmem:[%s822_s5] sm:$0x3] }
  0x11   :  { %v164_v20 = vrot.slane %v37_v8, %v663_v18  ;;  %v160_v21 = vrot.slane %v37_v8, %v655_v14 }
  0x14   :  { %250 = vperm.xlu1 %572, %v33_v9   ;;  %266 = vperm.xlu0 %573, %v35_v10  }
  0x18   :  { %257 = vperm.xlu1 %572, %v34_v11  }
  0x81   :  { %v48_v44 = vpop.permute.xlu0 %47  ;;  %v80_v45 = vpop.permute.xlu1 %79 }
  0x82   :  { %v69_v58 = vmul.f32 %v64_v40, %v48_v44  ;;  %v70_v59 = vmul.f32 %v68_v41, %v48_v44  ;;  %v374_v60 = vmul.f32 %v369_v42, %v48_v44  ;;  %v375_v61 = vmul.f32 %v373_v43, %v48_v44 }
  0x83   :  { %v100_v62 = vmul.f32 %v95_v46, %v80_v45  ;;  %v101_v63 = vmul.f32 %v99_v47, %v80_v45  ;;  %v396_v0 = vmul.f32 %v391_v48, %v80_v45  ;;  %v397_v1 = vmul.f32 %v395_v49, %v80_v45  ;;  %v31_v46 = vld [vmem:[%s820_s3 + $0x20] sm:$0xff]  ;;  %v30_v47 = vld [vmem:[%s820_s3 + $0x18] sm:$0xff]  ;;  %v32_v49 = vld [vmem:[%s820_s3 + $0x28] sm:$0xff]  ;;  %s588_s3 = smov 16  }
  0x84   :  { %v186_v40 = vrot.slane %v550_v37, %v663_v18  ;;  %v182_v41 = vrot.slane %v550_v37, %v655_v14  ;;  %v36_v48 = vld [vmem:[%s823_s4] sm:$0xff]  ;;  %s589_s4 = smov 112  }
  0x85   :  { %v74_v2 = vpop.permute.xlu0 %73 }
  0x86   :  { %v76_v3 = vadd.f32 %v74_v2, %v69_v58  ;;  %v77_v4 = vadd.f32 %v74_v2, %v70_v59  ;;  %v376_v5 = vadd.f32 %v374_v60, %v74_v2  ;;  %v377_v6 = vadd.f32 %v375_v61, %v74_v2  ;;  %v106_v7 = vpop.permute.xlu1 %105 }
  0x87   :  { %v126_v9 = vmul.f32 %v121_v50, %v106_v7  ;;  %v127_v10 = vmul.f32 %v125_v51, %v106_v7  ;;  %v418_v11 = vmul.f32 %v413_v52, %v106_v7  ;;  %v419_v13 = vmul.f32 %v417_v53, %v106_v7 }
  0x88   :  { %v102_v15 = vadd.f32 %v100_v62, %v76_v3  ;;  %v103_v16 = vadd.f32 %v101_v63, %v77_v4  ;;  %v398_v17 = vadd.f32 %v396_v0, %v376_v5  ;;  %v399_v19 = vadd.f32 %v397_v1, %v377_v6 }
  0x8a   :  { %v128_v22 = vadd.f32 %v126_v9, %v102_v15  ;;  %v129_v23 = vadd.f32 %v127_v10, %v103_v16  ;;  %v420_v24 = vadd.f32 %v418_v11, %v398_v17  ;;  %v421_v25 = vadd.f32 %v419_v13, %v399_v19  ;;  %v132_v26 = vpop.permute.xlu0 %131 }
  0x8b   :  { %v152_v27 = vmul.f32 %v147_v54, %v132_v26  ;;  %v153_v28 = vmul.f32 %v151_v55, %v132_v26  ;;  %v440_v29 = vmul.f32 %v435_v56, %v132_v26  ;;  %v441_v30 = vmul.f32 %v439_v57, %v132_v26  ;;  %v201_v50 = vpop.permute.xlu1 %200 }
  0x8c   :  { %v724_v54 = vand.u32 127, %v51_v12 }
  0x8d   :  { %v690_v31 = vadd.f32 %v152_v27, %v128_v22  ;;  %v692_v32 = vadd.f32 %v153_v28, %v129_v23  ;;  %v694_v33 = vadd.f32 %v440_v29, %v420_v24  ;;  %v696_v34 = vadd.f32 %v441_v30, %v421_v25 }
  0x8e   :  { %vm175_vm0 = vcmp.lt.s32.totalorder %v724_v54, 1  ;;  %vm195_vm1 = vcmp.lt.s32.totalorder %v724_v54, 127  ;;  %vm284_vm2 = vcmp.lt.s32.totalorder %v724_v54, 16  ;;  %vm306_vm3 = vcmp.lt.s32.totalorder %v724_v54, 112 }
  0x8f   :  { %v168_v35 = vmul.f32 %v164_v20, %v692_v32  ;;  %v167_v36 = vmul.f32 %v160_v21, %v690_v31  ;;  %v445_v38 = vmul.f32 %v696_v34, %v164_v20  ;;  %v444_v39 = vmul.f32 %v694_v33, %v160_v21  ;;  %v208_v51 = vpop.permute.xlu1 %207  ;;  %v217_v53 = vpop.permute.xlu0 %216 }
  0x90   :  { %v190_v42 = vmul.f32 %v186_v40, %v692_v32  ;;  %v189_v43 = vmul.f32 %v182_v41, %v690_v31  ;;  %v453_v44 = vmul.f32 %v696_v34, %v186_v40  ;;  %v452_v45 = vmul.f32 %v694_v33, %v182_v41 }
  0x91   :  { %171 = vrot.lane.b32.xlu0 %v168_v35, %s586_s22  ;;  %169 = vrot.lane.b32.xlu1 %v167_v36, %s586_s22  ;;  %v210_v12 = vmul.f32 %v208_v51, %v690_v31  ;;  %v211_v1 = vmul.f32 %v208_v51, %v692_v32  ;;  %v462_v16 = vmul.f32 %v694_v33, %v208_v51 }
  0x92   :  { %v463_v17 = vmul.f32 %v696_v34, %v208_v51 }
  0x93   :  { %v251_v52 = vpop.permute.xlu1 %250  ;;  %v267_v56 = vpop.permute.xlu0 %266 }
  0x95   :  { %448 = vrot.lane.b32.xlu0 %v445_v38, %s586_s22  ;;  %446 = vrot.lane.b32.xlu1 %v444_v39, %s586_s22 }
  0x97   :  { %v258_v55 = vpop.permute.xlu1 %257 }
  0x98   :  { %v261_v35 = vmul.f32 %v258_v55, %v692_v32  ;;  %v260_v39 = vmul.f32 %v258_v55, %v690_v31 }
  0x99   :  { %193 = vrot.lane.b32.xlu0 %v190_v42, %s587_s23  ;;  %191 = vrot.lane.b32.xlu1 %v189_v43, %s587_s23 }
  0x9d   :  { %456 = vrot.lane.b32.xlu0 %v453_v44, %s587_s23  ;;  %454 = vrot.lane.b32.xlu1 %v452_v45, %s587_s23  ;;  %v483_v45 = vmul.f32 %v696_v34, %v258_v55 }
  0xa1   :  { %232 = vperm.xlu0 %573, %v31_v46   ;;  %225 = vperm.xlu1 %572, %v30_v47  }
  0xa5   :  { %275 = vperm.xlu0 %573, %v36_v48   ;;  %241 = vperm.xlu1 %572, %v32_v49   ;;  %v482_v48 = vmul.f32 %v694_v33, %v258_v55 }
 0x103   :  { %v172_v57 = vpop.permute.xlu0 %171  ;;  %v170_v58 = vpop.permute.xlu1 %169 }
 0x104   :  { %v727_v59 = vsel %vm175_vm0, %v170_v58, %v172_v57  ;;  %v729_v60 = vsel %vm175_vm0, %v172_v57, %v170_v58 }
 0x105   :  { %v203_v63 = vmul.f32 %v201_v50, %v729_v60  ;;  %v204_v0 = vmul.f32 %v201_v50, %v727_v59  ;;  %v254_v23 = vmul.f32 %v251_v52, %v727_v59  ;;  %v253_v30 = vmul.f32 %v251_v52, %v729_v60 }
 0x107   :  { %v449_v61 = vpop.permute.xlu0 %448  ;;  %v447_v62 = vpop.permute.xlu1 %446  ;;  %v213_v8 = vadd.f32 %v211_v1, %v204_v0  ;;  %v212_v9 = vadd.f32 %v210_v12, %v203_v63  ;;  %v263_v42 = vadd.f32 %v261_v35, %v254_v23  ;;  %v262_v44 = vadd.f32 %v260_v39, %v253_v30 }
 0x108   :  { %v736_v2 = vsel %vm175_vm0, %v447_v62, %v449_v61  ;;  %v738_v3 = vsel %vm175_vm0, %v449_v61, %v447_v62 }
 0x109   :  { %v460_v10 = vmul.f32 %v738_v3, %v201_v50  ;;  %v461_v11 = vmul.f32 %v736_v2, %v201_v50  ;;  %v481_v41 = vmul.f32 %v736_v2, %v251_v52  ;;  %v480_v43 = vmul.f32 %v738_v3, %v251_v52 }
 0x10b   :  { %v194_v4 = vpop.permute.xlu0 %193  ;;  %v192_v5 = vpop.permute.xlu1 %191  ;;  %v465_v28 = vadd.f32 %v463_v17, %v461_v11  ;;  %v464_v29 = vadd.f32 %v462_v16, %v460_v10  ;;  %v485_v51 = vadd.f32 %v483_v45, %v481_v41 }
 0x10c   :  { %v742_v6 = vsel %vm195_vm1, %v192_v5, %v194_v4  ;;  %v746_v7 = vsel %vm195_vm1, %v194_v4, %v192_v5 }
 0x10d   :  { %v219_v13 = vmul.f32 %v217_v53, %v742_v6  ;;  %v220_v15 = vmul.f32 %v217_v53, %v746_v7  ;;  %v270_v36 = vmul.f32 %v267_v56, %v746_v7  ;;  %v269_v40 = vmul.f32 %v267_v56, %v742_v6 }
 0x10f   :  { %v457_v19 = vpop.permute.xlu0 %456  ;;  %v455_v20 = vpop.permute.xlu1 %454  ;;  %v222_v21 = vadd.f32 %v220_v15, %v213_v8  ;;  %v221_v22 = vadd.f32 %v219_v13, %v212_v9  ;;  %v272_v47 = vadd.f32 %v270_v36, %v263_v42  ;;  %v271_v50 = vadd.f32 %v269_v40, %v262_v44 }
 0x110   :  { %v458_v24 = vsel %vm195_vm1, %v455_v20, %v457_v19  ;;  %v459_v25 = vsel %vm195_vm1, %v457_v19, %v455_v20 }
 0x111   :  { %v466_v26 = vmul.f32 %v458_v24, %v217_v53  ;;  %v467_v27 = vmul.f32 %v459_v25, %v217_v53  ;;  %282 = vrot.lane.b32.xlu0 %v222_v21, %s588_s3  ;;  %280 = vrot.lane.b32.xlu1 %v221_v22, %s588_s3  ;;  %v487_v46 = vmul.f32 %v459_v25, %v267_v56  ;;  %v552_v22 = vld [vmem:[%s822_s5 + $0x6] sm:$0x3] }
 0x112   :  { %v486_v49 = vmul.f32 %v458_v24, %v267_v56  ;;  %v484_v53 = vadd.f32 %v482_v48, %v480_v43 }
 0x113   :  { %v469_v37 = vadd.f32 %v467_v27, %v465_v28  ;;  %v468_v38 = vadd.f32 %v466_v26, %v464_v29  ;;  %v489_v57 = vadd.f32 %v487_v46, %v485_v51  ;;  %v313_v27 = vrot.slane %v552_v22, %v655_v14 }
 0x114   :  { %v488_v58 = vadd.f32 %v486_v49, %v484_v53  ;;  %v317_v28 = vrot.slane %v552_v22, %v663_v18 }
 0x115   :  { %494 = vrot.lane.b32.xlu0 %v469_v37, %s588_s3  ;;  %492 = vrot.lane.b32.xlu1 %v468_v38, %s588_s3 }
 0x119   :  { %304 = vrot.lane.b32.xlu0 %v272_v47, %s589_s4  ;;  %302 = vrot.lane.b32.xlu1 %v271_v50, %s589_s4 }
 0x11d   :  { %504 = vrot.lane.b32.xlu0 %v489_v57, %s589_s4  ;;  %502 = vrot.lane.b32.xlu1 %v488_v58, %s589_s4 }
 0x120   :  { %v233_v52 = vpop.permute.xlu0 %232  ;;  %v226_v61 = vpop.permute.xlu1 %225 }
 0x121   :  { %v235_v62 = vmul.f32 %v233_v52, %v690_v31  ;;  %v236_v63 = vmul.f32 %v233_v52, %v692_v32  ;;  %v472_v0 = vmul.f32 %v694_v33, %v233_v52  ;;  %v473_v55 = vmul.f32 %v696_v34, %v233_v52 }
 0x122   :  { %v228_v56 = vmul.f32 %v226_v61, %v729_v60  ;;  %v229_v12 = vmul.f32 %v226_v61, %v727_v59  ;;  %v470_v1 = vmul.f32 %v738_v3, %v226_v61  ;;  %v471_v4 = vmul.f32 %v736_v2, %v226_v61  ;;  %v551_v2 = vld [vmem:[%s822_s5 + $0x4] sm:$0x3] }
 0x123   :  { %v291_v19 = vrot.slane %v551_v2, %v655_v14 }
 0x124   :  { %v237_v5 = vadd.f32 %v235_v62, %v228_v56  ;;  %v238_v8 = vadd.f32 %v236_v63, %v229_v12  ;;  %v474_v9 = vadd.f32 %v472_v0, %v470_v1  ;;  %v475_v10 = vadd.f32 %v473_v55, %v471_v4  ;;  %v242_v11 = vpop.permute.xlu1 %241  ;;  %v276_v59 = vpop.permute.xlu0 %275 }
 0x125   :  { %v244_v31 = vmul.f32 %v242_v11, %v742_v6  ;;  %v245_v32 = vmul.f32 %v242_v11, %v746_v7  ;;  %v476_v33 = vmul.f32 %v458_v24, %v242_v11  ;;  %v477_v13 = vmul.f32 %v459_v25, %v242_v11 }
 0x126   :  { %v295_v6 = vrot.slane %v551_v2, %v663_v18 }
 0x127   :  { %v246_v34 = vadd.f32 %v244_v31, %v237_v5  ;;  %v247_v15 = vadd.f32 %v245_v32, %v238_v8  ;;  %v478_v60 = vadd.f32 %v476_v33, %v474_v9  ;;  %v479_v16 = vadd.f32 %v477_v13, %v475_v10 }
 0x129   :  { %v278_v29 = vadd.f32 %v276_v59, %v246_v34  ;;  %v279_v36 = vadd.f32 %v276_v59, %v247_v15  ;;  %v490_v18 = vadd.f32 %v478_v60, %v276_v59  ;;  %v491_v46 = vadd.f32 %v479_v16, %v276_v59 }
 0x183   :  { %v283_v3 = vpop.permute.xlu0 %282  ;;  %v281_v17 = vpop.permute.xlu1 %280 }
 0x184   :  { %v286_v7 = vsel %vm284_vm2, %v283_v3, %v281_v17  ;;  %v285_v20 = vsel %vm284_vm2, %v281_v17, %v283_v3 }
 0x185   :  { %v298_v24 = vmul.f32 %v291_v19, %v286_v7  ;;  %v299_v25 = vmul.f32 %v295_v6, %v285_v20 }
 0x187   :  { %v495_v21 = vpop.permute.xlu0 %494  ;;  %v493_v23 = vpop.permute.xlu1 %492  ;;  %v300_v38 = vadd.f32 %v298_v24, %v278_v29  ;;  %v301_v42 = vadd.f32 %v299_v25, %v279_v36 }
 0x188   :  { %v497_v26 = vsel %vm284_vm2, %v495_v21, %v493_v23  ;;  %v496_v30 = vsel %vm284_vm2, %v493_v23, %v495_v21 }
 0x189   :  { %v498_v39 = vmul.f32 %v497_v26, %v291_v19  ;;  %v499_v43 = vmul.f32 %v496_v30, %v295_v6 }
 0x18b   :  { %v305_v35 = vpop.permute.xlu0 %304  ;;  %v303_v37 = vpop.permute.xlu1 %302  ;;  %v500_v50 = vadd.f32 %v498_v39, %v490_v18  ;;  %v501_v57 = vadd.f32 %v499_v43, %v491_v46 }
 0x18c   :  { %v307_v40 = vsel %vm306_vm3, %v303_v37, %v305_v35  ;;  %v308_v41 = vsel %vm306_vm3, %v305_v35, %v303_v37 }
 0x18d   :  { %v320_v14 = vmul.f32 %v313_v27, %v307_v40  ;;  %v321_v44 = vmul.f32 %v317_v28, %v308_v41 }
 0x18f   :  { %v505_v45 = vpop.permute.xlu0 %504  ;;  %v503_v47 = vpop.permute.xlu1 %502  ;;  %v322_v48 = vadd.f32 %v320_v14, %v300_v38  ;;  %v323_v49 = vadd.f32 %v321_v44, %v301_v42 }
 0x190   :  { %v506_v51 = vsel %vm306_vm3, %v503_v47, %v505_v45  ;;  %v507_v53 = vsel %vm306_vm3, %v505_v45, %v503_v47 }
 0x191   :  { %v508_v58 = vmul.f32 %v506_v51, %v313_v27  ;;  %v509_v52 = vmul.f32 %v507_v53, %v317_v28  ;;  %v324_v61 = vadd.f32 %v323_v49, %v322_v48 }
 0x193   :  { %325 = vadd.xlane.f32.xlu1 %v324_v61  ;;  %v510_v62 = vadd.f32 %v508_v58, %v500_v50  ;;  %v511_v63 = vadd.f32 %v509_v52, %v501_v57 }
 0x195   :  { %v512_v0 = vadd.f32 %v511_v63, %v510_v62 }
 0x197   :  { %513 = vadd.xlane.f32.xlu0 %v512_v0 }
 0x220   :  { %v326_v55 = vpop.xlane.xlu1 %325 }
 0x221   :  { %v327_v56 = vmul.f32 0.00390625, %v326_v55 }
 0x223   :  { %v328_v12 = vsub.f32 %v322_v48, %v327_v56  ;;  %v329_v1 = vsub.f32 %v323_v49, %v327_v56 }
 0x224   :  { %v514_v4 = vpop.xlane.xlu0 %513 }
 0x225   :  { %v515_v5 = vmul.f32 0.00390625, %v514_v4  ;;  %v330_v8 = vmul.f32 %v328_v12, %v328_v12  ;;  %v331_v9 = vmul.f32 %v329_v1, %v329_v1 }
 0x227   :  { %v516_v10 = vsub.f32 %v510_v62, %v515_v5  ;;  %v517_v54 = vsub.f32 %v511_v63, %v515_v5  ;;  %v332_v11 = vadd.f32 %v331_v9, %v330_v8 }
 0x229   :  { %333 = vadd.xlane.f32.xlu0 %v332_v11  ;;  %v518_v31 = vmul.f32 %v516_v10, %v516_v10  ;;  %v519_v32 = vmul.f32 %v517_v54, %v517_v54 }
 0x22b   :  { %v520_v33 = vadd.f32 %v519_v32, %v518_v31 }
 0x22d   :  { %521 = vadd.xlane.f32.xlu1 %v520_v33 }
 0x2b6   :  { %v334_v13 = vpop.xlane.xlu0 %333 }
 0x2b7   :  { %v335_v34 = vmul.f32 0.00390625, %v334_v13 }
 0x2b9   :  { %v336_v15 = vadd.f32 1e-05, %v335_v34 }
 0x2ba   :  { %v522_v60 = vpop.xlane.xlu1 %521 }
 0x2bb   :  { %574 = vrsqrt.f32 %v336_v15  ;;  %v523_v16 = vmul.f32 0.00390625, %v522_v60 }
 0x2bc   :  { %576 = vrcp.f32 %v336_v15 }
 0x2bd   :  { %v524_v59 = vadd.f32 1e-05, %v523_v16 }
 0x2bf   :  { %578 = vrsqrt.f32 %v524_v59 }
 0x2c0   :  { %580 = vrcp.f32 %v524_v59 }
 0x2c5   :  { %v575_v2 = vpop.eup %574 }
 0x2c6   :  { %v577_v3 = vpop.eup %576  ;;  %v338_v17 = vmul.f32 %v575_v2, %v328_v12  ;;  %v339_v19 = vmul.f32 %v575_v2, %v329_v1 }
 0x2c7   :  { %v341_v6 = vmul.f32 %v577_v3, %v335_v34 }
 0x2c8   :  { %v558_v7 = vpack.c.bf16 %v339_v19, %v338_v17 }
 0x2c9   :  { %v579_v20 = vpop.eup %578  ;;  %352 = vst.msk [vmem:[%s824_s7] sm:$0xff] %vm351_vm4, %v341_v6 }
 0x2ca   :  { %v581_v21 = vpop.eup %580  ;;  %350 = vst [vmem:[%s825_s6] sm:$0xff] %v558_v7  ;;  %v526_v22 = vmul.f32 %v579_v20, %v516_v10  ;;  %v527_v23 = vmul.f32 %v579_v20, %v517_v54 }
 0x2cb   :  { %v529_v24 = vmul.f32 %v581_v21, %v523_v16 }
 0x2cc   :  { %v559_v25 = vpack.c.bf16 %v527_v23, %v526_v22 }
 0x2cd   :  { %557 = vst.msk [vmem:[%s824_s7 + $0x8] sm:$0xff] %vm351_vm4, %v529_v24 }
 0x2ce   :  { %556 = vst [vmem:[%s825_s6 + $0x8] sm:$0xff] %v559_v25 }

// kernel: _forward_impl.4
= control target key start
LH: loop header
LB: loop body
LE: loop exit
PB: predicated region body
PF: predicated region fallthrough
CT: control target
= control target key end

     0   :  { %v655_v0 = vmov 0   ;;  %v656_v5 = vmov 2   ;;  %v657_v6 = vmov 1   ;;  %v658_v7 = vmov 3   ;;  %s663_s11 = smov 1   ;;  %s664_s12 = smov 127   ;;  %s963_s3 = inlined_call_operand.vmem [shape: f32[8,8], index: 3, kind: input, shape index: {}]   ;;  %s964_s1 = inlined_call_operand.vmem [shape: f32[8,1], index: 1, kind: input, shape index: {}]   ;;  %s965_s4 = inlined_call_operand.vmem [shape: f32[8,1], index: 4, kind: input, shape index: {}]   ;;  %s966_s2 = inlined_call_operand.vmem [shape: f32[8,1], index: 2, kind: input, shape index: {}]   ;;  %s967_s5 = inlined_call_operand.vmem [shape: f32[9,8,1], index: 5, kind: input, shape index: {}]   ;;  %s968_s0 = inlined_call_operand.vmem [shape: bf16[2,8,256], index: 0, kind: input, shape index: {}]   ;;  %s969_s7 = inlined_call_operand.vmem [shape: f32[4,1,256], index: 7, kind: input, shape index: {}]   ;;  %s970_s6 = inlined_call_operand.vmem [shape: f32[8,1], index: 6, kind: input, shape index: {}]   ;;  %s971_s9 = inlined_call_operand.vmem [shape: f32[2,8,1], index: 9, kind: output, shape index: {1}]   ;;  %s972_s8 = inlined_call_operand.vmem [shape: bf16[2,8,256], index: 8, kind: output, shape index: {0}]  }
   0x1   :  { %637 = vset.pattern.permute.xlu1 %v655_v0  ;;  %636 = vset.pattern.permute.xlu0 %v655_v0  ;;  %v31_v1 = vld [vmem:[%s963_s3] sm:$0xff]  ;;  %v659_v8 = vmov 4   ;;  %v660_v9 = vmov 5   ;;  %v661_v10 = vmov 7   ;;  %v35_v11 = vld [vmem:[%s967_s5 + $0x10] sm:$0xff]  ;;  %v662_v12 = vmov 6  }
   0x2   :  { %v43_v2 = vld [vmem:[%s964_s1] sm:$0xff]  ;;  %73 = vperm.xlu1 %637, %v31_v1   ;;  %v34_v15 = vld [vmem:[%s967_s5 + $0x8] sm:$0xff]  ;;  %v39_v16 = vld [vmem:[%s967_s5 + $0x30] sm:$0xff]  ;;  %v76_v20 = vlaneseq  ;;  %vm400_vm4 = vcmask 7168  }
   0x3   :  { %57 = vperm.xlu0 %636, %v43_v2   ;;  %v32_v3 = vld [vmem:[%s965_s4] sm:$0xff]  ;;  %v40_v17 = vld [vmem:[%s967_s5 + $0x38] sm:$0xff]  ;;  %v618_v19 = vld [vmem:[%s968_s0 + $0x8] sm:$0xff] }
   0x4   :  { %v44_v4 = vld [vmem:[%s966_s2] sm:$0xff]  ;;  %v404_v23 = vunpack.c.l.bf16 %v618_v19  ;;  %v405_v24 = vunpack.c.h.bf16 %v618_v19  ;;  %v77_v27 = vshrl.u32 %v76_v20, 7 }
   0x5   :  { %v41_v13 = vld [vmem:[%s967_s5 + $0x40] sm:$0xff] }
   0x6   :  { %88 = vperm.xlu1 %637, %v32_v3   ;;  %v33_v14 = vld [vmem:[%s967_s5] sm:$0xff]  ;;  %v115_v34 = vsub.s32 2, %v77_v27  ;;  %v754_v39 = vsub.s32 0, %v77_v27  ;;  %v756_v40 = vsub.s32 1, %v77_v27  ;;  %v131_v45 = vsub.s32 3, %v77_v27 }
   0x7   :  { %64 = vperm.xlu0 %636, %v44_v4   ;;  %v52_v18 = vld [vmem:[%s968_s0] sm:$0xff]  ;;  %v768_v49 = vsub.s32 4, %v77_v27  ;;  %v770_v50 = vsub.s32 5, %v77_v27  ;;  %v782_v58 = vsub.s32 7, %v77_v27  ;;  %v784_v59 = vsub.s32 6, %v77_v27 }
   0x8   :  { %v53_v21 = vunpack.c.l.bf16 %v52_v18  ;;  %v54_v22 = vunpack.c.h.bf16 %v52_v18 }
   0xa   :  { %639 = vset.pattern.permute.xlu1 %v656_v5 }
   0xb   :  { %638 = vset.pattern.permute.xlu0 %v657_v6  ;;  %110 = vperm.xlu1 %639, %v31_v1  }
   0xc   :  { %94 = vperm.xlu0 %638, %v31_v1  }
   0xf   :  { %640 = vset.pattern.permute.xlu1 %v658_v7 }
  0x10   :  { %641 = vset.pattern.permute.xlu0 %v659_v8  ;;  %126 = vperm.xlu1 %640, %v31_v1  }
  0x11   :  { %142 = vperm.xlu0 %641, %v31_v1  }
  0x14   :  { %642 = vset.pattern.permute.xlu1 %v660_v9 }
  0x15   :  { %644 = vset.pattern.permute.xlu0 %v661_v10  ;;  %158 = vperm.xlu1 %642, %v31_v1  }
  0x16   :  { %190 = vperm.xlu0 %644, %v31_v1  }
  0x19   :  { %643 = vset.pattern.permute.xlu1 %v662_v12 }
  0x1a   :  { %646 = vset.pattern.permute.xlu0 %v655_v0  ;;  %174 = vperm.xlu1 %643, %v31_v1  }
  0x1b   :  { %265 = vperm.xlu0 %646, %v35_v11  }
  0x1e   :  { %645 = vset.pattern.permute.xlu1 %v655_v0 }
  0x1f   :  { %315 = vperm.xlu0 %646, %v41_v13   ;;  %249 = vperm.xlu1 %645, %v33_v14  }
  0x23   :  { %256 = vperm.xlu1 %645, %v34_v15  }
  0x27   :  { %299 = vperm.xlu1 %645, %v39_v16  }
  0x2b   :  { %306 = vperm.xlu1 %645, %v40_v17  }
  0x81   :  { %v74_v25 = vpop.permute.xlu1 %73 }
  0x82   :  { %v58_v26 = vpop.permute.xlu0 %57 }
  0x83   :  { %v60_v28 = vmul.f32 %v58_v26, %v53_v21  ;;  %v61_v29 = vmul.f32 %v58_v26, %v54_v22  ;;  %v406_v30 = vmul.f32 %v404_v23, %v58_v26  ;;  %v407_v31 = vmul.f32 %v405_v24, %v58_v26 }
  0x85   :  { %v89_v32 = vpop.permute.xlu1 %88 }
  0x86   :  { %v65_v33 = vpop.permute.xlu0 %64 }
  0x87   :  { %v67_v35 = vadd.f32 %v65_v33, %v60_v28  ;;  %v68_v36 = vadd.f32 %v65_v33, %v61_v29  ;;  %v408_v37 = vadd.f32 %v406_v30, %v65_v33  ;;  %v409_v38 = vadd.f32 %v407_v31, %v65_v33 }
  0x89   :  { %v758_v41 = vmax.f32 %v67_v35, 0.0  ;;  %v760_v42 = vmax.f32 %v68_v36, 0.0  ;;  %v762_v43 = vmax.f32 %v408_v37, 0.0  ;;  %v764_v44 = vmax.f32 %v409_v38, 0.0 }
  0x8a   :  { %v111_v46 = vpop.permute.xlu1 %110 }
  0x8b   :  { %v116_v47 = vrot.slane %v758_v41, %v115_v34  ;;  %v120_v48 = vrot.slane %v760_v42, %v115_v34  ;;  %v79_v51 = vrot.slane %v758_v41, %v754_v39  ;;  %v83_v52 = vrot.slane %v760_v42, %v754_v39  ;;  %v95_v57 = vpop.permute.xlu0 %94 }
  0x8c   :  { %v100_v53 = vrot.slane %v758_v41, %v756_v40  ;;  %v104_v54 = vrot.slane %v760_v42, %v756_v40  ;;  %v439_v55 = vrot.slane %v762_v43, %v115_v34  ;;  %v443_v56 = vrot.slane %v764_v44, %v115_v34 }
  0x8d   :  { %v121_v60 = vmul.f32 %v116_v47, %v111_v46  ;;  %v122_v61 = vmul.f32 %v120_v48, %v111_v46  ;;  %v84_v62 = vmul.f32 %v79_v51, %v74_v25  ;;  %v85_v63 = vmul.f32 %v83_v52, %v74_v25 }
  0x8e   :  { %v415_v0 = vrot.slane %v762_v43, %v754_v39  ;;  %v419_v1 = vrot.slane %v764_v44, %v754_v39  ;;  %v427_v2 = vrot.slane %v762_v43, %v756_v40  ;;  %v431_v3 = vrot.slane %v764_v44, %v756_v40 }
  0x8f   :  { %v91_v4 = vadd.f32 %v89_v32, %v84_v62  ;;  %v92_v5 = vadd.f32 %v89_v32, %v85_v63  ;;  %v105_v6 = vmul.f32 %v100_v53, %v95_v57  ;;  %v106_v7 = vmul.f32 %v104_v54, %v95_v57  ;;  %v127_v12 = vpop.permute.xlu1 %126 }
  0x90   :  { %v444_v8 = vmul.f32 %v439_v55, %v111_v46  ;;  %v445_v9 = vmul.f32 %v443_v56, %v111_v46  ;;  %v420_v10 = vmul.f32 %v415_v0, %v74_v25  ;;  %v421_v11 = vmul.f32 %v419_v1, %v74_v25  ;;  %v143_v30 = vpop.permute.xlu0 %142  ;;  %v45_v56 = vld [vmem:[%s969_s7] sm:$0x3] }
  0x91   :  { %v107_v13 = vadd.f32 %v105_v6, %v91_v4  ;;  %v108_v14 = vadd.f32 %v106_v7, %v92_v5  ;;  %v132_v15 = vrot.slane %v758_v41, %v131_v45  ;;  %v136_v16 = vrot.slane %v760_v42, %v131_v45 }
  0x92   :  { %v422_v17 = vadd.f32 %v420_v10, %v89_v32  ;;  %v423_v18 = vadd.f32 %v421_v11, %v89_v32  ;;  %v432_v19 = vmul.f32 %v427_v2, %v95_v57  ;;  %v433_v21 = vmul.f32 %v431_v3, %v95_v57 }
  0x93   :  { %v123_v22 = vadd.f32 %v121_v60, %v107_v13  ;;  %v124_v23 = vadd.f32 %v122_v61, %v108_v14  ;;  %v137_v24 = vmul.f32 %v132_v15, %v127_v12  ;;  %v138_v26 = vmul.f32 %v136_v16, %v127_v12 }
  0x94   :  { %v434_v27 = vadd.f32 %v432_v19, %v422_v17  ;;  %v435_v28 = vadd.f32 %v433_v21, %v423_v18  ;;  %v451_v29 = vrot.slane %v762_v43, %v131_v45  ;;  %v455_v25 = vrot.slane %v764_v44, %v131_v45  ;;  %v159_v46 = vpop.permute.xlu1 %158 }
  0x95   :  { %v139_v31 = vadd.f32 %v137_v24, %v123_v22  ;;  %v140_v33 = vadd.f32 %v138_v26, %v124_v23  ;;  %v148_v34 = vrot.slane %v758_v41, %v768_v49  ;;  %v152_v32 = vrot.slane %v760_v42, %v768_v49 }
  0x96   :  { %v446_v35 = vadd.f32 %v444_v8, %v434_v27  ;;  %v447_v36 = vadd.f32 %v445_v9, %v435_v28  ;;  %v456_v37 = vmul.f32 %v451_v29, %v127_v12  ;;  %v457_v38 = vmul.f32 %v455_v25, %v127_v12  ;;  %v191_v8 = vpop.permute.xlu0 %190 }
  0x97   :  { %v153_v47 = vmul.f32 %v148_v34, %v143_v30  ;;  %v154_v48 = vmul.f32 %v152_v32, %v143_v30  ;;  %v463_v51 = vrot.slane %v762_v43, %v768_v49  ;;  %v467_v45 = vrot.slane %v764_v44, %v768_v49 }
  0x98   :  { %v458_v52 = vadd.f32 %v456_v37, %v446_v35  ;;  %v459_v53 = vadd.f32 %v457_v38, %v447_v36  ;;  %v164_v54 = vrot.slane %v758_v41, %v770_v50  ;;  %v168_v55 = vrot.slane %v760_v42, %v770_v50 }
  0x99   :  { %v155_v57 = vadd.f32 %v153_v47, %v139_v31  ;;  %v156_v60 = vadd.f32 %v154_v48, %v140_v33  ;;  %v468_v61 = vmul.f32 %v463_v51, %v143_v30  ;;  %v469_v62 = vmul.f32 %v467_v45, %v143_v30  ;;  %v175_v9 = vpop.permute.xlu1 %174  ;;  %v37_v45 = vld [vmem:[%s967_s5 + $0x20] sm:$0xff] }
  0x9a   :  { %v169_v63 = vmul.f32 %v164_v54, %v159_v46  ;;  %v170_v0 = vmul.f32 %v168_v55, %v159_v46  ;;  %v475_v49 = vrot.slane %v762_v43, %v770_v50  ;;  %v479_v1 = vrot.slane %v764_v44, %v770_v50  ;;  %v38_v54 = vld [vmem:[%s967_s5 + $0x28] sm:$0xff] }
  0x9b   :  { %v213_v2 = vrot.slane %v45_v56, %v756_v40  ;;  %v209_v3 = vrot.slane %v45_v56, %v754_v39  ;;  %v470_v4 = vadd.f32 %v468_v61, %v458_v52  ;;  %v471_v5 = vadd.f32 %v469_v62, %v459_v53  ;;  %v36_v52 = vld [vmem:[%s967_s5 + $0x18] sm:$0xff]  ;;  %v42_v53 = vld [vmem:[%s970_s6] sm:$0xff]  ;;  %s665_s5 = smov 16   ;;  %s666_s6 = smov 112  }
  0x9c   :  { %v480_v6 = vmul.f32 %v475_v49, %v159_v46  ;;  %v481_v7 = vmul.f32 %v479_v1, %v159_v46  ;;  %v196_v10 = vrot.slane %v758_v41, %v782_v58  ;;  %v200_v11 = vrot.slane %v760_v42, %v782_v58 }
  0x9d   :  { %v180_v12 = vrot.slane %v758_v41, %v784_v59  ;;  %v184_v50 = vrot.slane %v760_v42, %v784_v59  ;;  %v171_v13 = vadd.f32 %v169_v63, %v155_v57  ;;  %v172_v14 = vadd.f32 %v170_v0, %v156_v60  ;;  %v266_v60 = vpop.permute.xlu0 %265 }
  0x9e   :  { %v487_v15 = vrot.slane %v762_v43, %v784_v59  ;;  %v491_v16 = vrot.slane %v764_v44, %v784_v59  ;;  %v201_v17 = vmul.f32 %v196_v10, %v191_v8  ;;  %v202_v18 = vmul.f32 %v200_v11, %v191_v8  ;;  %v250_v55 = vpop.permute.xlu1 %249 }
  0x9f   :  { %v185_v19 = vmul.f32 %v180_v12, %v175_v9  ;;  %v186_v21 = vmul.f32 %v184_v50, %v175_v9  ;;  %v482_v22 = vadd.f32 %v480_v6, %v470_v4  ;;  %v483_v23 = vadd.f32 %v481_v7, %v471_v5 }
  0xa0   :  { %v492_v24 = vmul.f32 %v487_v15, %v175_v9  ;;  %v493_v26 = vmul.f32 %v491_v16, %v175_v9  ;;  %v499_v41 = vrot.slane %v762_v43, %v782_v58  ;;  %v503_v42 = vrot.slane %v764_v44, %v782_v58  ;;  %v614_v44 = vld [vmem:[%s969_s7 + $0x2] sm:$0x3] }
  0xa1   :  { %v187_v27 = vadd.f32 %v185_v19, %v171_v13  ;;  %v188_v28 = vadd.f32 %v186_v21, %v172_v14  ;;  %v235_v37 = vrot.slane %v614_v44, %v756_v40  ;;  %v231_v38 = vrot.slane %v614_v44, %v754_v39  ;;  %v316_v63 = vpop.permute.xlu0 %315 }
  0xa2   :  { %v494_v29 = vadd.f32 %v492_v24, %v482_v22  ;;  %v495_v25 = vadd.f32 %v493_v26, %v483_v23  ;;  %v504_v30 = vmul.f32 %v499_v41, %v191_v8  ;;  %v505_v59 = vmul.f32 %v503_v42, %v191_v8  ;;  %v257_v56 = vpop.permute.xlu1 %256 }
  0xa3   :  { %v835_v31 = vadd.f32 %v201_v17, %v187_v27  ;;  %v837_v33 = vadd.f32 %v202_v18, %v188_v28  ;;  %v869_v61 = vand.u32 127, %v76_v20 }
  0xa4   :  { %v839_v34 = vadd.f32 %v504_v30, %v494_v29  ;;  %v841_v32 = vadd.f32 %v505_v59, %v495_v25 }
  0xa5   :  { %v217_v35 = vmul.f32 %v213_v2, %v837_v33  ;;  %v216_v43 = vmul.f32 %v209_v3, %v835_v31  ;;  %v239_v46 = vmul.f32 %v235_v37, %v837_v33  ;;  %v238_v47 = vmul.f32 %v231_v38, %v835_v31 }
  0xa6   :  { %v509_v58 = vmul.f32 %v841_v32, %v213_v2  ;;  %v508_v36 = vmul.f32 %v839_v34, %v209_v3  ;;  %v517_v48 = vmul.f32 %v841_v32, %v235_v37  ;;  %v516_v51 = vmul.f32 %v839_v34, %v231_v38  ;;  %v300_v57 = vpop.permute.xlu1 %299 }
  0xa7   :  { %220 = vrot.lane.b32.xlu0 %v217_v35, %s663_s11  ;;  %218 = vrot.lane.b32.xlu1 %v216_v43, %s663_s11  ;;  %vm224_vm0 = vcmp.lt.s32.totalorder %v869_v61, 1  ;;  %vm244_vm1 = vcmp.lt.s32.totalorder %v869_v61, 127  ;;  %v259_v20 = vmul.f32 %v257_v56, %v835_v31  ;;  %v260_v7 = vmul.f32 %v257_v56, %v837_v33 }
  0xa8   :  { %v526_v19 = vmul.f32 %v839_v34, %v257_v56  ;;  %v527_v21 = vmul.f32 %v841_v32, %v257_v56  ;;  %vm333_vm2 = vcmp.lt.s32.totalorder %v869_v61, 16  ;;  %vm355_vm3 = vcmp.lt.s32.totalorder %v869_v61, 112 }
  0xaa   :  { %v307_v62 = vpop.permute.xlu1 %306 }
  0xab   :  { %512 = vrot.lane.b32.xlu0 %v509_v58, %s663_s11  ;;  %510 = vrot.lane.b32.xlu1 %v508_v36, %s663_s11  ;;  %v310_v35 = vmul.f32 %v307_v62, %v837_v33  ;;  %v309_v36 = vmul.f32 %v307_v62, %v835_v31 }
  0xaf   :  { %242 = vrot.lane.b32.xlu0 %v239_v46, %s664_s12  ;;  %240 = vrot.lane.b32.xlu1 %v238_v47, %s664_s12 }
  0xb3   :  { %520 = vrot.lane.b32.xlu0 %v517_v48, %s664_s12  ;;  %518 = vrot.lane.b32.xlu1 %v516_v51, %s664_s12  ;;  %v547_v51 = vmul.f32 %v841_v32, %v307_v62 }
  0xb7   :  { %281 = vperm.xlu0 %646, %v37_v45   ;;  %274 = vperm.xlu1 %645, %v36_v52  }
  0xbb   :  { %324 = vperm.xlu0 %646, %v42_v53   ;;  %290 = vperm.xlu1 %645, %v38_v54   ;;  %v546_v53 = vmul.f32 %v839_v34, %v307_v62 }
 0x119   :  { %v221_v0 = vpop.permute.xlu0 %220  ;;  %v219_v49 = vpop.permute.xlu1 %218 }
 0x11a   :  { %v872_v1 = vsel %vm224_vm0, %v219_v49, %v221_v0  ;;  %v874_v2 = vsel %vm224_vm0, %v221_v0, %v219_v49 }
 0x11b   :  { %v252_v5 = vmul.f32 %v250_v55, %v874_v2  ;;  %v253_v6 = vmul.f32 %v250_v55, %v872_v1  ;;  %v303_v41 = vmul.f32 %v300_v57, %v872_v1  ;;  %v302_v59 = vmul.f32 %v300_v57, %v874_v2 }
 0x11d   :  { %v513_v3 = vpop.permute.xlu0 %512  ;;  %v511_v4 = vpop.permute.xlu1 %510  ;;  %v262_v13 = vadd.f32 %v260_v7, %v253_v6  ;;  %v261_v14 = vadd.f32 %v259_v20, %v252_v5  ;;  %v312_v46 = vadd.f32 %v310_v35, %v303_v41  ;;  %v311_v48 = vadd.f32 %v309_v36, %v302_v59 }
 0x11e   :  { %v881_v8 = vsel %vm224_vm0, %v511_v4, %v513_v3  ;;  %v883_v9 = vsel %vm224_vm0, %v513_v3, %v511_v4 }
 0x11f   :  { %v524_v15 = vmul.f32 %v883_v9, %v250_v55  ;;  %v525_v16 = vmul.f32 %v881_v8, %v250_v55  ;;  %v545_v38 = vmul.f32 %v881_v8, %v300_v57  ;;  %v544_v47 = vmul.f32 %v883_v9, %v300_v57 }
 0x121   :  { %v243_v10 = vpop.permute.xlu0 %242  ;;  %v241_v11 = vpop.permute.xlu1 %240  ;;  %v529_v25 = vadd.f32 %v527_v21, %v525_v16  ;;  %v528_v30 = vadd.f32 %v526_v19, %v524_v15  ;;  %v549_v56 = vadd.f32 %v547_v51, %v545_v38 }
 0x122   :  { %v887_v12 = vsel %vm244_vm1, %v241_v11, %v243_v10  ;;  %v891_v50 = vsel %vm244_vm1, %v243_v10, %v241_v11 }
 0x123   :  { %v268_v17 = vmul.f32 %v266_v60, %v887_v12  ;;  %v269_v18 = vmul.f32 %v266_v60, %v891_v50  ;;  %v319_v43 = vmul.f32 %v316_v63, %v891_v50  ;;  %v318_v37 = vmul.f32 %v316_v63, %v887_v12 }
 0x125   :  { %v521_v22 = vpop.permute.xlu0 %520  ;;  %v519_v23 = vpop.permute.xlu1 %518  ;;  %v271_v24 = vadd.f32 %v269_v18, %v262_v13  ;;  %v270_v26 = vadd.f32 %v268_v17, %v261_v14  ;;  %v321_v52 = vadd.f32 %v319_v43, %v312_v46  ;;  %v320_v55 = vadd.f32 %v318_v37, %v311_v48 }
 0x126   :  { %v522_v42 = vsel %vm244_vm1, %v519_v23, %v521_v22  ;;  %v523_v27 = vsel %vm244_vm1, %v521_v22, %v519_v23 }
 0x127   :  { %v530_v28 = vmul.f32 %v522_v42, %v266_v60  ;;  %v531_v29 = vmul.f32 %v523_v27, %v266_v60  ;;  %331 = vrot.lane.b32.xlu0 %v271_v24, %s665_s5  ;;  %329 = vrot.lane.b32.xlu1 %v270_v26, %s665_s5  ;;  %v551_v45 = vmul.f32 %v523_v27, %v316_v63  ;;  %v616_v26 = vld [vmem:[%s969_s7 + $0x6] sm:$0x3] }
 0x128   :  { %v550_v54 = vmul.f32 %v522_v42, %v316_v63  ;;  %v548_v60 = vadd.f32 %v546_v53, %v544_v47 }
 0x129   :  { %v533_v44 = vadd.f32 %v531_v29, %v529_v25  ;;  %v532_v58 = vadd.f32 %v530_v28, %v528_v30  ;;  %v553_v0 = vadd.f32 %v551_v45, %v549_v56  ;;  %v362_v29 = vrot.slane %v616_v26, %v754_v39 }
 0x12a   :  { %v552_v49 = vadd.f32 %v550_v54, %v548_v60  ;;  %v366_v25 = vrot.slane %v616_v26, %v756_v40 }
 0x12b   :  { %558 = vrot.lane.b32.xlu0 %v533_v44, %s665_s5  ;;  %556 = vrot.lane.b32.xlu1 %v532_v58, %s665_s5 }
 0x12f   :  { %353 = vrot.lane.b32.xlu0 %v321_v52, %s666_s6  ;;  %351 = vrot.lane.b32.xlu1 %v320_v55, %s666_s6 }
 0x133   :  { %568 = vrot.lane.b32.xlu0 %v553_v0, %s666_s6  ;;  %566 = vrot.lane.b32.xlu1 %v552_v49, %s666_s6 }
 0x136   :  { %v282_v57 = vpop.permute.xlu0 %281  ;;  %v275_v3 = vpop.permute.xlu1 %274 }
 0x137   :  { %v284_v4 = vmul.f32 %v282_v57, %v835_v31  ;;  %v285_v5 = vmul.f32 %v282_v57, %v837_v33  ;;  %v536_v6 = vmul.f32 %v839_v34, %v282_v57  ;;  %v537_v62 = vmul.f32 %v841_v32, %v282_v57 }
 0x138   :  { %v277_v63 = vmul.f32 %v275_v3, %v874_v2  ;;  %v278_v20 = vmul.f32 %v275_v3, %v872_v1  ;;  %v534_v7 = vmul.f32 %v883_v9, %v275_v3  ;;  %v535_v10 = vmul.f32 %v881_v8, %v275_v3  ;;  %v615_v8 = vld [vmem:[%s969_s7 + $0x4] sm:$0x3] }
 0x139   :  { %v340_v22 = vrot.slane %v615_v8, %v754_v39 }
 0x13a   :  { %v286_v11 = vadd.f32 %v284_v4, %v277_v63  ;;  %v287_v13 = vadd.f32 %v285_v5, %v278_v20  ;;  %v538_v14 = vadd.f32 %v536_v6, %v534_v7  ;;  %v539_v15 = vadd.f32 %v537_v62, %v535_v10  ;;  %v291_v16 = vpop.permute.xlu1 %290  ;;  %v325_v1 = vpop.permute.xlu0 %324 }
 0x13b   :  { %v293_v31 = vmul.f32 %v291_v16, %v887_v12  ;;  %v294_v33 = vmul.f32 %v291_v16, %v891_v50  ;;  %v540_v34 = vmul.f32 %v522_v42, %v291_v16  ;;  %v541_v17 = vmul.f32 %v523_v27, %v291_v16 }
 0x13c   :  { %v344_v12 = vrot.slane %v615_v8, %v756_v40 }
 0x13d   :  { %v295_v32 = vadd.f32 %v293_v31, %v286_v11  ;;  %v296_v18 = vadd.f32 %v294_v33, %v287_v13  ;;  %v542_v2 = vadd.f32 %v540_v34, %v538_v14  ;;  %v543_v19 = vadd.f32 %v541_v17, %v539_v15 }
 0x13f   :  { %v327_v30 = vadd.f32 %v325_v1, %v295_v32  ;;  %v328_v43 = vadd.f32 %v325_v1, %v296_v18  ;;  %v554_v40 = vadd.f32 %v542_v2, %v325_v1  ;;  %v555_v45 = vadd.f32 %v543_v19, %v325_v1 }
 0x199   :  { %v332_v9 = vpop.permute.xlu0 %331  ;;  %v330_v21 = vpop.permute.xlu1 %329 }
 0x19a   :  { %v335_v50 = vsel %vm333_vm2, %v332_v9, %v330_v21  ;;  %v334_v23 = vsel %vm333_vm2, %v330_v21, %v332_v9 }
 0x19b   :  { %v347_v42 = vmul.f32 %v340_v22, %v335_v50  ;;  %v348_v27 = vmul.f32 %v344_v12, %v334_v23 }
 0x19d   :  { %v559_v24 = vpop.permute.xlu0 %558  ;;  %v557_v41 = vpop.permute.xlu1 %556  ;;  %v349_v58 = vadd.f32 %v347_v42, %v327_v30  ;;  %v350_v46 = vadd.f32 %v348_v27, %v328_v43 }
 0x19e   :  { %v561_v28 = vsel %vm333_vm2, %v559_v24, %v557_v41  ;;  %v560_v59 = vsel %vm333_vm2, %v557_v41, %v559_v24 }
 0x19f   :  { %v562_v36 = vmul.f32 %v561_v28, %v340_v22  ;;  %v563_v47 = vmul.f32 %v560_v59, %v344_v12 }
 0x1a1   :  { %v354_v35 = vpop.permute.xlu0 %353  ;;  %v352_v44 = vpop.permute.xlu1 %351  ;;  %v564_v55 = vadd.f32 %v562_v36, %v554_v40  ;;  %v565_v0 = vadd.f32 %v563_v47, %v555_v45 }
 0x1a2   :  { %v356_v37 = vsel %vm355_vm3, %v352_v44, %v354_v35  ;;  %v357_v38 = vsel %vm355_vm3, %v354_v35, %v352_v44 }
 0x1a3   :  { %v369_v39 = vmul.f32 %v362_v29, %v356_v37  ;;  %v370_v48 = vmul.f32 %v366_v25, %v357_v38 }
 0x1a5   :  { %v569_v51 = vpop.permute.xlu0 %568  ;;  %v567_v52 = vpop.permute.xlu1 %566  ;;  %v371_v53 = vadd.f32 %v369_v39, %v349_v58  ;;  %v372_v54 = vadd.f32 %v370_v48, %v350_v46 }
 0x1a6   :  { %v570_v56 = vsel %vm355_vm3, %v567_v52, %v569_v51  ;;  %v571_v60 = vsel %vm355_vm3, %v569_v51, %v567_v52 }
 0x1a7   :  { %v572_v49 = vmul.f32 %v570_v56, %v362_v29  ;;  %v573_v57 = vmul.f32 %v571_v60, %v366_v25  ;;  %v373_v3 = vadd.f32 %v372_v54, %v371_v53 }
 0x1a9   :  { %374 = vadd.xlane.f32.xlu1 %v373_v3  ;;  %v574_v4 = vadd.f32 %v572_v49, %v564_v55  ;;  %v575_v5 = vadd.f32 %v573_v57, %v565_v0 }
 0x1ab   :  { %v576_v6 = vadd.f32 %v575_v5, %v574_v4 }
 0x1ad   :  { %577 = vadd.xlane.f32.xlu0 %v576_v6 }
 0x236   :  { %v375_v62 = vpop.xlane.xlu1 %374 }
 0x237   :  { %v376_v63 = vmul.f32 0.00390625, %v375_v62 }
 0x239   :  { %v377_v20 = vsub.f32 %v371_v53, %v376_v63  ;;  %v378_v7 = vsub.f32 %v372_v54, %v376_v63 }
 0x23a   :  { %v578_v10 = vpop.xlane.xlu0 %577 }
 0x23b   :  { %v579_v11 = vmul.f32 0.00390625, %v578_v10  ;;  %v379_v13 = vmul.f32 %v377_v20, %v377_v20  ;;  %v380_v14 = vmul.f32 %v378_v7, %v378_v7 }
 0x23d   :  { %v580_v15 = vsub.f32 %v574_v4, %v579_v11  ;;  %v581_v61 = vsub.f32 %v575_v5, %v579_v11  ;;  %v381_v16 = vadd.f32 %v380_v14, %v379_v13 }
 0x23f   :  { %382 = vadd.xlane.f32.xlu0 %v381_v16  ;;  %v582_v31 = vmul.f32 %v580_v15, %v580_v15  ;;  %v583_v33 = vmul.f32 %v581_v61, %v581_v61 }
 0x241   :  { %v584_v34 = vadd.f32 %v583_v33, %v582_v31 }
 0x243   :  { %585 = vadd.xlane.f32.xlu1 %v584_v34 }
 0x2cc   :  { %v383_v17 = vpop.xlane.xlu0 %382 }
 0x2cd   :  { %v384_v32 = vmul.f32 0.00390625, %v383_v17 }
 0x2cf   :  { %v385_v18 = vadd.f32 1e-05, %v384_v32 }
 0x2d0   :  { %v586_v2 = vpop.xlane.xlu1 %585 }
 0x2d1   :  { %647 = vrsqrt.f32 %v385_v18  ;;  %v587_v19 = vmul.f32 0.00390625, %v586_v2 }
 0x2d2   :  { %649 = vrcp.f32 %v385_v18 }
 0x2d3   :  { %v588_v1 = vadd.f32 1e-05, %v587_v19 }
 0x2d5   :  { %651 = vrsqrt.f32 %v588_v1 }
 0x2d6   :  { %653 = vrcp.f32 %v588_v1 }
 0x2db   :  { %v648_v8 = vpop.eup %647 }
 0x2dc   :  { %v650_v9 = vpop.eup %649  ;;  %v387_v21 = vmul.f32 %v648_v8, %v377_v20  ;;  %v388_v22 = vmul.f32 %v648_v8, %v378_v7 }
 0x2dd   :  { %v390_v12 = vmul.f32 %v650_v9, %v384_v32 }
 0x2de   :  { %v622_v50 = vpack.c.bf16 %v388_v22, %v387_v21 }
 0x2df   :  { %v652_v23 = vpop.eup %651  ;;  %401 = vst.msk [vmem:[%s971_s9] sm:$0xff] %vm400_vm4, %v390_v12 }
 0x2e0   :  { %v654_v24 = vpop.eup %653  ;;  %399 = vst [vmem:[%s972_s8] sm:$0xff] %v622_v50  ;;  %v590_v26 = vmul.f32 %v652_v23, %v580_v15  ;;  %v591_v41 = vmul.f32 %v652_v23, %v581_v61 }
 0x2e1   :  { %v593_v42 = vmul.f32 %v654_v24, %v587_v19 }
 0x2e2   :  { %v623_v27 = vpack.c.bf16 %v591_v41, %v590_v26 }
 0x2e3   :  { %621 = vst.msk [vmem:[%s971_s9 + $0x8] sm:$0xff] %vm400_vm4, %v593_v42 }
 0x2e4   :  { %620 = vst [vmem:[%s972_s8 + $0x8] sm:$0xff] %v623_v27 }

</bundles_post_ra>
